<compile_context>
chip_gen: v7x
topology: tpu7x:2x2x1
jax: 0.10.0
libtpu: 0.0.40
codegen_flags: <defaults>
</compile_context>

<pallas_src>
import functools

import jax
import jax.numpy as jnp
from jax.experimental import pallas as pl
from jax.experimental.pallas import tpu as pltpu

_SENT = 2 ** 30  # flat-index sentinel for masked/padded pillars; never matches a column


def _round_up(x, m):
    return (x + m - 1) // m * m


def _pick_tile_n(nxy, max_tile_n):
    # Largest multiple of 128 <= max_tile_n that divides NXY (no canvas padding,
    # no post-kernel slice); otherwise fall back to a padded lane-dense tile.
    hi = min(max_tile_n, _round_up(nxy, 128))
    for cand in range(hi, 127, -128):
        if nxy % cand == 0:
            return cand
    return hi


def _scatter_kernel(sp_ref, pb_ref, first_ref, valid_ref,
                    idx_ref, feat_ref, out_ref, *, tile_n, tile_p):
    # sp/pb/first/valid: [T] int32 work schedule in SMEM (scalar-prefetched)
    # idx_ref:  [tile_p, 1] int32 flat spatial index of the scheduled pillar block
    # feat_ref: [C, tile_p] features (mask already folded in) of that block
    # out_ref:  [C, tile_n] canvas tile sp_ref[t]; resident across consecutive
    #           steps that target the same spatial tile (accumulator).
    t = pl.program_id(0)

    @pl.when(first_ref[t] == 1)          # first visit of this spatial tile
    def _():
        out_ref[...] = jnp.zeros_like(out_ref)

    @pl.when(valid_ref[t] == 1)          # skip empty-tile / padding steps
    def _():
        # Shift pillar indices into tile-local column coordinates.
        idx_rel = idx_ref[...] - sp_ref[t] * tile_n                      # [tile_p, 1]
        col = jax.lax.broadcasted_iota(jnp.int32, (tile_p, tile_n), 1)   # [tile_p, tile_n]
        onehot = (col == idx_rel).astype(feat_ref.dtype)                 # [tile_p, tile_n]
        out_ref[...] += jnp.dot(feat_ref[...], onehot,
                                preferred_element_type=jnp.float32,
                                precision=jax.lax.Precision.HIGHEST)


def pointpillars_scatter(voxel_features, coords, voxel_mask, *, ny, nx,
                         max_tile_n=1024, max_tile_p=1024):
    """JAX/Pallas equivalent of PointPillarsScatter_trt.forward (batch_size == 1)."""
    C, P = voxel_features.shape
    NXY = ny * nx
    dtype = voxel_features.dtype

    # ---- tiling (static) ---------------------------------------------------
    tile_n = _pick_tile_n(NXY, max_tile_n)
    nxy_pad = _round_up(NXY, tile_n)
    num_sp = nxy_pad // tile_n                      # spatial tiles

    tile_p = min(max_tile_p, _round_up(P, 128))
    p_pad = _round_up(P, tile_p)
    num_pb = p_pad // tile_p                        # pillar blocks

    # ---- sort pillars by flat spatial index (wrapper side) ------------------
    mask = jnp.asarray(voxel_mask)[0]               # [P] bool
    coords = jnp.asarray(coords, jnp.int32)
    flat = jnp.where(mask, coords[:, 1] * nx + coords[:, 2], _SENT).astype(jnp.int32)

    order = jnp.argsort(flat)                       # invalid pillars sort to the end
    flat_s = jnp.pad(flat[order], (0, p_pad - P), constant_values=_SENT)       # [p_pad]
    feat = jnp.where(mask[None, :], voxel_features, 0).astype(dtype)           # fold mask
    feat_s = jnp.pad(feat[:, order], ((0, 0), (0, p_pad - P)))                 # [C, p_pad]

    # ---- per-spatial-tile pillar ranges + prefetched work schedule ----------
    tile_id = (flat_s // tile_n).astype(jnp.int32)                             # ascending
    j_arr = jnp.arange(num_sp, dtype=jnp.int32)
    off = jnp.searchsorted(tile_id, j_arr, side="left").astype(jnp.int32)
    end = jnp.searchsorted(tile_id, j_arr, side="right").astype(jnp.int32)
    cnt = end - off                                  # pillars landing in tile j
    pb_lo = off // tile_p
    pb_hi = jnp.maximum((end + tile_p - 1) // tile_p, pb_lo + 1)
    nblk = (pb_hi - pb_lo).astype(jnp.int32)         # >= 1 pillar blocks per tile

    cum = jnp.cumsum(nblk).astype(jnp.int32)
    total = cum[-1]                                  # actual number of work steps

    T = num_pb + num_sp + 1                          # static upper bound on steps
    t_arr = jnp.arange(T, dtype=jnp.int32)
    sp_t = jnp.minimum(
        jnp.searchsorted(cum, t_arr, side="right").astype(jnp.int32), num_sp - 1)
    r_t = t_arr - (cum - nblk)[sp_t]                 # block counter within the tile
    pb_t = jnp.clip(pb_lo[sp_t] + r_t, 0, num_pb - 1).astype(jnp.int32)
    in_range = t_arr < total
    first_t = (in_range & (r_t == 0)).astype(jnp.int32)        # zero out_ref on arrival
    valid_t = (in_range & (cnt[sp_t] > 0)).astype(jnp.int32)   # skip empty/pad steps

    kernel = functools.partial(_scatter_kernel, tile_n=tile_n, tile_p=tile_p)

    canvas = pl.pallas_call(
        kernel,
        out_shape=jax.ShapeDtypeStruct((C, nxy_pad), dtype),
        grid_spec=pltpu.PrefetchScalarGridSpec(
            num_scalar_prefetch=4,
            grid=(T,),
            in_specs=[
                # flat indices of the scheduled pillar block
                pl.BlockSpec((tile_p, 1), lambda t, sp, pb, fs, vl: (pb[t], 0)),
                # features of the scheduled pillar block
                pl.BlockSpec((C, tile_p), lambda t, sp, pb, fs, vl: (0, pb[t])),
            ],
            # data-dependent, consecutively-revisited (resident) canvas tile
            out_specs=pl.BlockSpec((C, tile_n), lambda t, sp, pb, fs, vl: (0, sp[t])),
        ),
        compiler_params=pltpu.CompilerParams(
            # Data-dependent output revisits -> reduction-style "arbitrary" axis.
            # TODO(synk): split the schedule across the two v7x TensorCores
            # (leading core axis + per-core halves of the schedule) for megacore.
            dimension_semantics=("arbitrary",),
        ),
    )(sp_t, pb_t, first_t, valid_t, flat_s[:, None], feat_s)

    # nxy_pad == NXY whenever a divisor tile_n exists, so this slice is a no-op.
    return canvas[:, :NXY].reshape(1, C, ny, nx)


if __name__ == "__main__":
    key = jax.random.PRNGKey(0)
    k_idx, k_feat, k_mask = jax.random.split(key, 3)

    C = 64            # num_input_features
    ny, nx = 16, 16   # output_shape[2], output_shape[3]
    P = 64            # number of pillars (voxels)
    NXY = ny * nx

    # Unique flat spatial indices (matches torch scatter_ determinism).
    flat_idx = jax.random.permutation(k_idx, NXY)[:P].astype(jnp.int32)        # [P]
    coords = jnp.stack(
        [jnp.zeros((P,), jnp.int32), flat_idx // nx, flat_idx % nx], axis=1)    # [P, 3]

    voxel_features = jax.random.normal(k_feat, (C, P), dtype=jnp.float32)       # [C, P]
    voxel_mask = (jax.random.uniform(k_mask, (1, P)) > 0.3)                     # [1, P]

    out = pointpillars_scatter(voxel_features, coords, voxel_mask, ny=ny, nx=nx)
    out = jax.block_until_ready(out)

    # Pure-JAX reference (scatter on zero canvas; masked pillars contribute 0).
    masked_feat = jnp.where(voxel_mask[0][None, :], voxel_features, 0.0)
    ref = jnp.zeros((C, NXY), jnp.float32).at[:, flat_idx].set(masked_feat)
    ref = ref.reshape(1, C, ny, nx)

    assert out.shape == (1, C, ny, nx)
    assert jnp.allclose(out, ref, atol=1e-5, rtol=1e-5), "mismatch vs reference"
    print("KERNEL_OK")
</pallas_src>

<mosaic_0001>
module attributes {stable_mosaic.version = 11 : i64} {
  func.func @_scatter_kernel(%arg0: i32, %arg1: memref<3xi32, #tpu.memory_space<smem>>, %arg2: memref<3xi32, #tpu.memory_space<smem>>, %arg3: memref<3xi32, #tpu.memory_space<smem>>, %arg4: memref<3xi32, #tpu.memory_space<smem>>, %arg5: memref<128x1xi32, #tpu.memory_space<vmem>>, %arg6: memref<64x128xf32, #tpu.memory_space<vmem>>, %arg7: memref<64x256xf32, #tpu.memory_space<vmem>>) attributes {dimension_semantics = [#tpu.dimension_semantics<arbitrary>], iteration_bounds = array<i64: 3>, scalar_prefetch = 4 : i64, scratch_operands = 0 : i64, tpu.core_type = #tpu.core_type<tc>, window_params = [{transform_indices = @transform_0, window_bounds = array<i64: 128, 1>}, {transform_indices = @transform_1, window_bounds = array<i64: 64, 128>}, {transform_indices = @transform_2, window_bounds = array<i64: 64, 256>}]} {
    %0 = arith.index_cast %arg0 : i32 to index
    %1 = memref.load %arg3[%0] : memref<3xi32, #tpu.memory_space<smem>>
    %c1_i32 = arith.constant 1 : i32
    %2 = arith.cmpi eq, %1, %c1_i32 : i32
    %3 = arith.extui %2 : i1 to i32
    %c0_i32 = arith.constant 0 : i32
    %4 = arith.cmpi ne, %3, %c0_i32 : i32
    scf.if %4 {
      %cst = arith.constant 0.000000e+00 : f32
      %10 = vector.broadcast %cst : f32 to vector<64x256xf32>
      %c0 = arith.constant 0 : index
      %c0_2 = arith.constant 0 : index
      %11 = vector.load %arg7[%c0, %c0_2] : memref<64x256xf32, #tpu.memory_space<vmem>>, vector<64x256xf32>
      tpu.vector_store %arg7[%c0, %c0_2], %10 {strides = array<i32>} : memref<64x256xf32, #tpu.memory_space<vmem>>, vector<64x256xf32>,
    } else {
    }
    %5 = arith.index_cast %arg0 : i32 to index
    %6 = memref.load %arg4[%5] : memref<3xi32, #tpu.memory_space<smem>>
    %c1_i32_0 = arith.constant 1 : i32
    %7 = arith.cmpi eq, %6, %c1_i32_0 : i32
    %8 = arith.extui %7 : i1 to i32
    %c0_i32_1 = arith.constant 0 : i32
    %9 = arith.cmpi ne, %8, %c0_i32_1 : i32
    scf.if %9 {
      %c0 = arith.constant 0 : index
      %c0_2 = arith.constant 0 : index
      %10 = vector.load %arg5[%c0, %c0_2] : memref<128x1xi32, #tpu.memory_space<vmem>>, vector<128x1xi32>
      %11 = arith.index_cast %arg0 : i32 to index
      %12 = memref.load %arg1[%11] : memref<3xi32, #tpu.memory_space<smem>>
      %c256_i32 = arith.constant 256 : i32
      %13 = arith.muli %12, %c256_i32 : i32
      %14 = vector.broadcast %13 : i32 to vector<128x1xi32>
      %15 = arith.subi %10, %14 : vector<128x1xi32>
      %16 = tpu.iota {dimensions = array<i32: 1>} : vector<128x256xi32>
      %17 = vector.broadcast %15 : vector<128x1xi32> to vector<128x256xi32>
      %18 = arith.cmpi eq, %16, %17 : vector<128x256xi32>
      %19 = arith.extui %18 : vector<128x256xi1> to vector<128x256xi32>
      %20 = arith.sitofp %19 : vector<128x256xi32> to vector<128x256xf32>
      %c0_3 = arith.constant 0 : index
      %c0_4 = arith.constant 0 : index
      %21 = vector.load %arg7[%c0_3, %c0_4] : memref<64x256xf32, #tpu.memory_space<vmem>>, vector<64x256xf32>
      %c0_5 = arith.constant 0 : index
      %c0_6 = arith.constant 0 : index
      %22 = vector.load %arg6[%c0_5, %c0_6] : memref<64x128xf32, #tpu.memory_space<vmem>>, vector<64x128xf32>
      %cst = arith.constant dense<0.000000e+00> : vector<64x256xf32>
      %23 = tpu.matmul %22, %20, %cst {dimension_numbers = #tpu.dot_dimension_numbers<[1], [0], [0], [1], [0, 0, 1, 1], [], []>, precision = #tpu.contract_precision<fp32>} : vector<64x128xf32>, vector<128x256xf32>, vector<64x256xf32> -> vector<64x256xf32>
      %24 = arith.addf %21, %23 : vector<64x256xf32>
      %c0_7 = arith.constant 0 : index
      %c0_8 = arith.constant 0 : index
      %25 = vector.load %arg7[%c0_7, %c0_8] : memref<64x256xf32, #tpu.memory_space<vmem>>, vector<64x256xf32>
      tpu.vector_store %arg7[%c0_7, %c0_8], %24 {strides = array<i32>} : memref<64x256xf32, #tpu.memory_space<vmem>>, vector<64x256xf32>,
    } else {
    }
    return
  }
  func.func @transform_0(%arg0: i32, %arg1: memref<3xi32, #tpu.memory_space<smem>>, %arg2: memref<3xi32, #tpu.memory_space<smem>>, %arg3: memref<3xi32, #tpu.memory_space<smem>>, %arg4: memref<3xi32, #tpu.memory_space<smem>>) -> (i32, i32) {
    %0 = arith.index_cast %arg0 : i32 to index
    %1 = memref.load %arg2[%0] : memref<3xi32, #tpu.memory_space<smem>>
    %c0_i32 = arith.constant 0 : i32
    %c0_i32_0 = arith.constant 0 : i32
    return %1, %c0_i32 : i32, i32
  }
  func.func @transform_1(%arg0: i32, %arg1: memref<3xi32, #tpu.memory_space<smem>>, %arg2: memref<3xi32, #tpu.memory_space<smem>>, %arg3: memref<3xi32, #tpu.memory_space<smem>>, %arg4: memref<3xi32, #tpu.memory_space<smem>>) -> (i32, i32) {
    %0 = arith.index_cast %arg0 : i32 to index
    %1 = memref.load %arg2[%0] : memref<3xi32, #tpu.memory_space<smem>>
    %c0_i32 = arith.constant 0 : i32
    %c0_i32_0 = arith.constant 0 : i32
    return %c0_i32, %1 : i32, i32
  }
  func.func @transform_2(%arg0: i32, %arg1: memref<3xi32, #tpu.memory_space<smem>>, %arg2: memref<3xi32, #tpu.memory_space<smem>>, %arg3: memref<3xi32, #tpu.memory_space<smem>>, %arg4: memref<3xi32, #tpu.memory_space<smem>>) -> (i32, i32) {
    %0 = arith.index_cast %arg0 : i32 to index
    %1 = memref.load %arg1[%0] : memref<3xi32, #tpu.memory_space<smem>>
    %c0_i32 = arith.constant 0 : i32
    %c0_i32_0 = arith.constant 0 : i32
    return %c0_i32, %1 : i32, i32
  }
}

</mosaic_0001>

<bundles_post_ra>
// kernel: tpu_custom_call.1
= control target key start
LH: loop header
LB: loop body
LE: loop exit
PB: predicated region body
PF: predicated region fallthrough
CT: control target
= control target key end

     0   :  { %s3624_s0 = inlined_call_operand.vmem [shape: s32[3], index: 0, kind: input, shape index: {}]   ;;  %s3625_s4 = inlined_call_operand.vmem [shape: s32[128,1], index: 4, kind: input, shape index: {}]   ;;  %s3626_s5 = inlined_call_operand.vmem [shape: f32[64,128], index: 5, kind: input, shape index: {}]   ;;  %s3627_s6 = inlined_call_operand.hbm [shape: f32[64,256], index: 6, kind: output, shape index: {}]   ;;  %s3628_s1 = inlined_call_operand.vmem [shape: s32[3], index: 1, kind: input, shape index: {}]   ;;  %s3629_s2 = inlined_call_operand.vmem [shape: s32[3], index: 2, kind: input, shape index: {}]   ;;  %s3630_s3 = inlined_call_operand.vmem [shape: s32[3], index: 3, kind: input, shape index: {}]  }
   0x1   :  { %s11_s23 = sshll.u32 %s3624_s0, 4  ;;  %s15_s26 = sshll.u32 %s3628_s1, 4  ;;  %s12_s23 = int_to_ptr.vmem [resolvable:$true] %s11_s23  ;;  %s16_s26 = int_to_ptr.vmem [resolvable:$true] %s15_s26 }
   0x2   :  { %s2222_s27 = scalar_lea.vmem %s12_s23, 16  ;;  %p2227_p1 = scmp.lt.s32.totalorder %s12_s23, %s12_s23 }
   0x3   :  { %p2223_p0 = scmp.ne.s32.totalorder %s12_s23, %s2222_s27  ;;  %p2228_p2 = scmp.lt.s32.totalorder %s2222_s27, %s2222_s27 }
   0x5   :  { %p2229_p3 = por %p2228_p2, %p2227_p1 }
   0x7   :  { %p2230_p4 = pnand %p2229_p3, %p2223_p0 }
   0x9   :  { %2233 = shalt.err (!%p2230_p4)  }
   0xa   :  { %s2336_s28 = smov [#allocation3]   ;;  %s2234_s29 = scalar_lea.vmem %s16_s26, 16 }
   0xb   :  { %14 = dma.vmem_to_smem %s12_s23, 16, %s2336_s28, [#allocation2] }
   0xc   :  { %p2235_p5 = scmp.ne.s32.totalorder %s16_s26, %s2234_s29  ;;  %p2239_p6 = scmp.lt.s32.totalorder %s16_s26, %s16_s26 }
   0xd   :  { %p2240_p7 = scmp.lt.s32.totalorder %s2234_s29, %s2234_s29 }
   0xf   :  { %p2241_p8 = por %p2240_p7, %p2239_p6 }
  0x11   :  { %p2242_p9 = pnand %p2241_p8, %p2235_p5 }
  0x13   :  { %2245 = shalt.err (!%p2242_p9)  }
  0x14   :  { %s2337_s0 = smov [#allocation4]   ;;  %s19_s7 = sshll.u32 %s3629_s2, 4  ;;  %s20_s7 = int_to_ptr.vmem [resolvable:$true] %s19_s7 }
  0x15   :  { %18 = dma.vmem_to_smem %s16_s26, 16, %s2337_s0, [#allocation2] }
  0x16   :  { %s23_s10 = sshll.u32 %s3630_s3, 4  ;;  %s2246_s11 = scalar_lea.vmem %s20_s7, 16  ;;  %s24_s10 = int_to_ptr.vmem [resolvable:$true] %s23_s10 }
  0x17   :  { %p2247_p10 = scmp.ne.s32.totalorder %s20_s7, %s2246_s11  ;;  %p2251_p11 = scmp.lt.s32.totalorder %s20_s7, %s20_s7 }
  0x18   :  { %p2252_p12 = scmp.lt.s32.totalorder %s2246_s11, %s2246_s11 }
  0x1a   :  { %p2253_p13 = por %p2252_p12, %p2251_p11 }
  0x1c   :  { %p2254_p0 = pnand %p2253_p13, %p2247_p10 }
  0x1e   :  { %2257 = shalt.err (!%p2254_p0)  }
  0x1f   :  { %s2338_s12 = smov [#allocation5]   ;;  %s2258_s13 = scalar_lea.vmem %s24_s10, 16 }
  0x20   :  { %22 = dma.vmem_to_smem %s20_s7, 16, %s2338_s12, [#allocation2] }
  0x21   :  { %p2259_p1 = scmp.ne.s32.totalorder %s24_s10, %s2258_s13  ;;  %p2263_p2 = scmp.lt.s32.totalorder %s24_s10, %s24_s10 }
  0x22   :  { %p2264_p3 = scmp.lt.s32.totalorder %s2258_s13, %s2258_s13 }
  0x24   :  { %p2265_p4 = por %p2264_p3, %p2263_p2 }
  0x26   :  { %p2266_p5 = pnand %p2265_p4, %p2259_p1 }
  0x28   :  { %2269 = shalt.err (!%p2266_p5)  }
  0x29   :  { %s2339_s2 = smov [#allocation6]  }
  0x2a   :  { %26 = dma.vmem_to_smem %s24_s10, 16, %s2339_s2, [#allocation2] }
  0x2b   :  { %2314 = dma.done.wait [#allocation2], 64 }
  0x2c   :  { %2315 = vsyncadd [#allocation2], 4294967232 }
  0x2d   :  { %28 = sfence }
  0x2e   :  { %29 = vsyncpa [#allocation8], 0 }
  0x2f   :  { %31 = vsyncpa [#allocation8 + $0x1], 0  ;;  %s2394_s3 = smov 0   ;;  %s2396_s14 = smov 0  }
  0x30   :  { %s2398_s15 = smov 0   ;;  %s2400_s16 = smov 0  }
  0x31 LB: > { %s2415_s17 = sadd.s32 4294967295, %s2334_s16   ;;  %s1752_s18 = sadd.s32 4294967294, %s2334_s16   ;;  %s2334_s16 = sphi %s2400_s16, %s3918_s16   ;;  %s2330_s15 = sphi %s2398_s15, %s3917_s15   ;;  %s2326_s14 = sphi %s2396_s14, %s3916_s14   ;;  %s2322_s3 = sphi %s2394_s3, %s3915_s3  }
  0x32   : > { %s2419_s19 = sadd.s32 1, %s2334_s16   ;;  %s97_s20 = sld [smem:[#allocation3 + %s2334_s16]] }
  0x33   : > { %s98_s21 = sld [smem:[#allocation3 + %s2419_s19]]  ;;  %p112_p6 = scmp.ne.s32.totalorder %s2330_s15, %s2326_s14 }
  0x34   : > { %p113_p7 = scmp.eq.s32.totalorder %s2415_s17, 2  ;;  %p118_p8 = scmp.ne.s32.totalorder %s2326_s14, %s2322_s3 }
  0x35   : > { %p119_p9 = scmp.eq.s32.totalorder %s1752_s18, 2  ;;  %p1755_p11 = scmp.ge.s32.totalorder %s2334_s16, 1 }
  0x36   : > { %p2428_p10 = por %p113_p7, %p112_p6  ;;  %p157_p13 = scmp.lt.s32.totalorder %s2334_s16, 4 }
  0x37   : > { %p2433_p12 = por %p119_p9, %p118_p8  ;;  %s102_s24 = sadd.s32 1, %s2330_s15 }
  0x38   : > { %p158_p0 = pnand %p1755_p11, %p157_p13 }
  0x39   : > { %s99_s25 = ssub.s32 %s97_s20, %s98_s21  ;;  %s182_s27 = sand.u32 (!%p158_p0), 1, %s2326_s14  }
  0x3a   : > { %p100_p1 = scmp.eq.s32.totalorder %s99_s25, 0  ;;  %161 = sbr.rel (%p158_p0) target bundleno = 625 (0x271), region = 28 }
  0x3b   : > { %s185_s28 = sld [smem:[#allocation4 + %s2415_s17]] (!%p158_p0)  ;;  %s1756_s29 = sshll.u32 (!%p158_p0), %s182_s27, 7 }
  0x3c   : > { %s2440_s26 = scalar_select %p100_p1, %s2330_s15, %s102_s24  }
  0x3d   : > { %s193_s0 = sld [smem:[#allocation4 + %s2415_s17]] (!%p158_p0)  ;;  %s2458_s18 = scalar_lea.vmem (!%p158_p0), [#allocation7], %s1756_s29 }
  0x3e   : > { %s201_s1 = sld [smem:[#allocation5 + %s2415_s17]] (!%p158_p0) }
  0x41   : > { %s1757_s30 = sshll.u32 %s185_s28, 4 }
  0x42   : > { %p187_p2 = scmp.lt.s32.totalorder %s1757_s30, 15 }
  0x43   : > { %p194_p3 = scmp.lt.s32.totalorder %s193_s0, 0 }
  0x44   : > { %s3920_s30 = smov (!%p187_p2, %s1757_s30), 15  ;;  %p1760_p4 = scmp.ne.s32.totalorder %s201_s1, 1 }
  0x45   : > { %s3922_s0 = smov (!%p194_p3, %s193_s0), 0  ;;  %s1758_s7 = sshll.u32 %s3920_s30, 3  ;;  %v2340_v0 = vmov (!%p1760_p4), 0.0  }
  0x46   : > { %s2451_s10 = scalar_lea.vmem %s3625_s4, %s1758_s7  ;;  %s1759_s11 = sshll.u32 %s3922_s0, 3  ;;  %206 = vst [vmem:[%s2458_s18] sm:$0xff] (!%p1760_p4), %v2340_v0  ;;  %207 = vst [vmem:[%s2458_s18 + $0x8] sm:$0xff] (!%p1760_p4), %v2340_v0 }
  0x47   : > { %s2456_s2 = scalar_lea.vmem %s3626_s5, %s1759_s11  ;;  %205 = sbr.rel (%p1760_p4) target bundleno = 78 (0x4e), region = 32  ;;  %208 = vst [vmem:[%s2458_s18 + $0x10] sm:$0xff] (!%p1760_p4), %v2340_v0  ;;  %209 = vst [vmem:[%s2458_s18 + $0x18] sm:$0xff] (!%p1760_p4), %v2340_v0 }
  0x48   : > { %210 = vst [vmem:[%s2458_s18 + $0x20] sm:$0xff] (!%p1760_p4), %v2340_v0  ;;  %211 = vst [vmem:[%s2458_s18 + $0x28] sm:$0xff] (!%p1760_p4), %v2340_v0 }
  0x49   : > { %212 = vst [vmem:[%s2458_s18 + $0x30] sm:$0xff] (!%p1760_p4), %v2340_v0  ;;  %213 = vst [vmem:[%s2458_s18 + $0x38] sm:$0xff] (!%p1760_p4), %v2340_v0 }
  0x4a   : > { %214 = vst [vmem:[%s2458_s18 + $0x40] sm:$0xff] (!%p1760_p4), %v2340_v0  ;;  %215 = vst [vmem:[%s2458_s18 + $0x48] sm:$0xff] (!%p1760_p4), %v2340_v0 }
  0x4b   : > { %216 = vst [vmem:[%s2458_s18 + $0x50] sm:$0xff] (!%p1760_p4), %v2340_v0  ;;  %217 = vst [vmem:[%s2458_s18 + $0x58] sm:$0xff] (!%p1760_p4), %v2340_v0 }
  0x4c   : > { %218 = vst [vmem:[%s2458_s18 + $0x60] sm:$0xff] (!%p1760_p4), %v2340_v0  ;;  %219 = vst [vmem:[%s2458_s18 + $0x68] sm:$0xff] (!%p1760_p4), %v2340_v0 }
  0x4d   : > { %220 = vst [vmem:[%s2458_s18 + $0x70] sm:$0xff] (!%p1760_p4), %v2340_v0  ;;  %221 = vst [vmem:[%s2458_s18 + $0x78] sm:$0xff] (!%p1760_p4), %v2340_v0 }
  0x4e PF: > { %s222_s20 = sld [smem:[#allocation6 + %s2415_s17]] }
  0x54   : > { %p1761_p5 = scmp.ne.s32.totalorder %s222_s20, 1 }
  0x56   : > { %226 = sbr.rel (%p1761_p5) target bundleno = 598 (0x256), region = 36 }
  0x5d   : > { %s243_s21 = sld [smem:[#allocation3 + %s2415_s17]]  ;;  %v2341_v1 = vmov 0   ;;  %v3644_v2 = vmov 0.0   ;;  %v229_v3 = vld [vmem:[%s2451_s10 + $0x10] sm:$0xff]  ;;  %v227_v4 = vld [vmem:[%s2451_s10] sm:$0xff]  ;;  %v230_v6 = vld [vmem:[%s2451_s10 + $0x18] sm:$0xff]  ;;  %v262_v38 = vlaneseq }
  0x5e   : > { %2221 = vset.pattern.permute.xlu1 %v2341_v1  ;;  %2220 = vset.pattern.permute.xlu0 %v2341_v1  ;;  %v228_v7 = vld [vmem:[%s2451_s10 + $0x8] sm:$0xff]  ;;  %v231_v13 = vld [vmem:[%s2451_s10 + $0x20] sm:$0xff]  ;;  %v234_v16 = vld [vmem:[%s2451_s10 + $0x38] sm:$0xff] }
  0x5f   : > { %529 = vmatprep.mubr.f32.mxu1 %v3644_v2  ;;  %1188 = vmatprep.mubr.f32.mxu0 %v3644_v2  ;;  %v232_v12 = vld [vmem:[%s2451_s10 + $0x28] sm:$0xff]  ;;  %v233_v17 = vld [vmem:[%s2451_s10 + $0x30] sm:$0xff]  ;;  %v235_v21 = vld [vmem:[%s2451_s10 + $0x40] sm:$0xff]  ;;  %v2510_v47 = vand.u32 127, %v262_v38 }
  0x60   : > { %v236_v20 = vld [vmem:[%s2451_s10 + $0x48] sm:$0xff]  ;;  %v238_v24 = vld [vmem:[%s2451_s10 + $0x58] sm:$0xff]  ;;  %v237_v25 = vld [vmem:[%s2451_s10 + $0x50] sm:$0xff] }
  0x61   : > { %v240_v28 = vld [vmem:[%s2451_s10 + $0x68] sm:$0xff]  ;;  %v239_v29 = vld [vmem:[%s2451_s10 + $0x60] sm:$0xff]  ;;  %v242_v32 = vld [vmem:[%s2451_s10 + $0x78] sm:$0xff]  ;;  %v2532_v57 = vadd.s32 128, %v2510_v47 }
  0x62   : > { %v241_v33 = vld [vmem:[%s2451_s10 + $0x70] sm:$0xff]  ;;  %v425_v36 = vld [vmem:[%s2456_s2] sm:$0xff]  ;;  %v426_v37 = vld [vmem:[%s2456_s2 + $0x8] sm:$0xff] }
  0x63   : > { %s1762_s24 = sshll.u32 %s243_s21, 8  ;;  %v2498_v39 = vand.u32 4294901760, %v425_v36  ;;  %v427_v40 = vld [vmem:[%s2456_s2 + $0x10] sm:$0xff]  ;;  %v428_v41 = vld [vmem:[%s2456_s2 + $0x18] sm:$0xff]  ;;  %v2502_v42 = vand.u32 4294901760, %v426_v37  ;;  %v429_v43 = vld [vmem:[%s2456_s2 + $0x20] sm:$0xff] }
  0x64   : > { %v245_v5 = vstv %s1762_s24  ;;  %v430_v44 = vld [vmem:[%s2456_s2 + $0x28] sm:$0xff]  ;;  %v2506_v45 = vand.u32 4294901760, %v427_v40  ;;  %v2508_v46 = vand.u32 4294901760, %v428_v41  ;;  %v2520_v52 = vand.u32 4294901760, %v429_v43  ;;  %v431_v56 = vld [vmem:[%s2456_s2 + $0x30] sm:$0xff] }
  0x65   : > { %v248_v8 = vsub.s32 %v229_v3, %v245_v5  ;;  %v246_v9 = vsub.s32 %v227_v4, %v245_v5  ;;  %v249_v10 = vsub.s32 %v230_v6, %v245_v5  ;;  %v247_v11 = vsub.s32 %v228_v7, %v245_v5  ;;  %3712 = vst [vmem:[#allocation12_spill] sm:$0xff] %v2498_v39 }
  0x66   : > { %v251_v14 = vsub.s32 %v232_v12, %v245_v5  ;;  %v250_v15 = vsub.s32 %v231_v13, %v245_v5  ;;  %v253_v18 = vsub.s32 %v234_v16, %v245_v5  ;;  %v252_v19 = vsub.s32 %v233_v17, %v245_v5  ;;  %3713 = vst [vmem:[#allocation13_spill] sm:$0xff] %v2502_v42  ;;  %v432_v12 = vld [vmem:[%s2456_s2 + $0x38] sm:$0xff] }
  0x67   : > { %272 = vperm.xlu1 %2221, %v248_v8   ;;  %266 = vperm.xlu0 %2220, %v246_v9   ;;  %v255_v22 = vsub.s32 %v236_v20, %v245_v5  ;;  %v254_v23 = vsub.s32 %v235_v21, %v245_v5  ;;  %v257_v26 = vsub.s32 %v238_v24, %v245_v5  ;;  %v2522_v53 = vand.u32 4294901760, %v430_v44 }
  0x68   : > { %v256_v27 = vsub.s32 %v237_v25, %v245_v5  ;;  %v259_v30 = vsub.s32 %v240_v28, %v245_v5  ;;  %v258_v31 = vsub.s32 %v239_v29, %v245_v5  ;;  %v261_v34 = vsub.s32 %v242_v32, %v245_v5  ;;  %3714 = vst [vmem:[#allocation14_spill] sm:$0xff] %v2506_v45 }
  0x69   : > { %v260_v35 = vsub.s32 %v241_v33, %v245_v5  ;;  %3715 = vst [vmem:[#allocation15_spill] sm:$0xff] %v2508_v46  ;;  %v2515_v50 = vsub.f32 %v425_v36, %v2498_v39  ;;  %v2518_v51 = vsub.f32 %v426_v37, %v2502_v42  ;;  %3718 = vst [vmem:[#allocation18_spill] sm:$0xff] %v2520_v52  ;;  %v2551_v0 = vand.u32 4294901760, %v431_v56 }
  0x6a   : > { %3719 = vst [vmem:[#allocation19_spill] sm:$0xff] %v2522_v53  ;;  %v2525_v54 = vsub.f32 %v427_v40, %v2506_v45  ;;  %v2528_v55 = vsub.f32 %v428_v41, %v2508_v46  ;;  %v2541_v62 = vsub.f32 %v429_v43, %v2520_v52  ;;  %v2544_v63 = vsub.f32 %v430_v44, %v2522_v53 }
  0x6b   : > { %275 = vperm.xlu1 %2221, %v249_v10   ;;  %269 = vperm.xlu0 %2220, %v247_v11   ;;  %3716 = vst [vmem:[#allocation16_spill] sm:$0xff] %v2515_v50  ;;  %3717 = vst [vmem:[#allocation17_spill] sm:$0xff] %v2518_v51  ;;  %v3641_v60 = vand.u32 4294901760, %v2515_v50  ;;  %v3638_v61 = vand.u32 4294901760, %v2518_v51  ;;  %v3725_v9 = vmov 0  ;;  %v2613_v16 = vsub.f32 %v431_v56, %v2551_v0 }
  0x6c   : > { %3720 = vst [vmem:[#allocation20_spill] sm:$0xff] %v2525_v54  ;;  %3721 = vst [vmem:[#allocation21_spill] sm:$0xff] %v2528_v55  ;;  %v3636_v1 = vand.u32 4294901760, %v2525_v54  ;;  %v3635_v3 = vand.u32 4294901760, %v2528_v55  ;;  %v3634_v11 = vand.u32 4294901760, %v2541_v62  ;;  %v3732_v17 = vmov 0 }
  0x6d   : > { %3722 = vst [vmem:[#allocation22_spill] sm:$0xff] %v2541_v62  ;;  %3723 = vst [vmem:[#allocation23_spill] sm:$0xff] %v2544_v63  ;;  %v2568_v6 = vsub.f32 %v2515_v50, %v3641_v60  ;;  %v2590_v10 = vsub.f32 %v2518_v51, %v3638_v61  ;;  %v3653_v13 = vmov 1.0|1.0   ;;  %v2655_v24 = vand.u32 4294901760, %v432_v12 }
  0x6e   : > { %3724 = vst [vmem:[#allocation24_spill] sm:$0xff] %v2551_v0  ;;  %3731 = vst [vmem:[#allocation27_spill] sm:$0xff] %v2613_v16  ;;  %v3632_v32 = vand.u32 4294901760, %v2613_v16  ;;  %v3740_v33 = vmov 0  ;;  %v3765_v52 = vmov 0 }
  0x6f   : > { %281 = vperm.xlu1 %2221, %v251_v14   ;;  %278 = vperm.xlu0 %2220, %v250_v15   ;;  %v3728_v14 = vmov 0  ;;  %v3633_v15 = vand.u32 4294901760, %v2544_v63  ;;  %3735 = vst [vmem:[#allocation29_spill] sm:$0xff] %v2655_v24  ;;  %v2728_v41 = vsub.f32 %v432_v12, %v2655_v24 }
  0x70   : > { %v2759_v12 = vsub.f32 %v2613_v16, %v3632_v32 }
  0x71   : > { %3743 = vst [vmem:[#allocation33_spill] sm:$0xff] %v2728_v41 }
  0x73   : > { %287 = vperm.xlu1 %2221, %v253_v18   ;;  %284 = vperm.xlu0 %2220, %v252_v19   ;;  %v2635_v18 = vsub.f32 %v2525_v54, %v3636_v1  ;;  %v2640_v19 = vsub.f32 %v2528_v55, %v3635_v3 }
  0x77   : > { %293 = vperm.xlu1 %2221, %v255_v22   ;;  %290 = vperm.xlu0 %2220, %v254_v23  }
  0x7b   : > { %299 = vperm.xlu1 %2221, %v257_v26   ;;  %296 = vperm.xlu0 %2220, %v256_v27   ;;  %v2667_v27 = vsub.f32 %v2541_v62, %v3634_v11  ;;  %v3756_v11 = vmov 0 }
  0x7f   : > { %305 = vperm.xlu1 %2221, %v259_v30   ;;  %302 = vperm.xlu0 %2220, %v258_v31   ;;  %v3736_v30 = vmov 0  ;;  %v2688_v31 = vsub.f32 %v2544_v63, %v3633_v15 }
  0x81   : > { %3739 = vst [vmem:[#allocation31_spill] sm:$0xff] %v2688_v31 }
  0x83   : > { %311 = vperm.xlu1 %2221, %v261_v34   ;;  %308 = vperm.xlu0 %2220, %v260_v35  }
  0xe6   : > { %v273_v48 = vpop.permute.xlu1 %272  ;;  %v2512_v49 = vpop.permute.xlu0 %266 }
  0xe7   : > { %vm317_vm0 = vcmp.eq.s32.totalorder %v2510_v47, %v273_v48  ;;  %vm313_vm1 = vcmp.eq.s32.totalorder %v2510_v47, %v2512_v49  ;;  %vm314_vm4 = vcmp.eq.s32.totalorder %v2532_v57, %v2512_v49  ;;  %vm318_vm7 = vcmp.eq.s32.totalorder %v2532_v57, %v273_v48 }
  0xe8   : > { %v1767_v7 = vsel %vm317_vm0, 1.0, %v3644_v2  ;;  %v1763_v8 = vsel %vm313_vm1, 1.0, %v3644_v2  ;;  %v1768_v28 = vsel %vm318_vm7, 1.0, %v3644_v2  ;;  %v1764_v44 = vsel %vm314_vm4, 1.0, %v3644_v2 }
  0xe9   : > { %v2642_v20 = vsub.f32 %v1767_v7, %v1767_v7  ;;  %v2644_v21 = vsub.f32 %v1763_v8, %v1763_v8  ;;  %v2730_v43 = vsub.f32 %v1768_v28, %v1768_v28  ;;  %v3745_v8 = vmov 0 }
  0xea   : > { %v2534_v58 = vpop.permute.xlu1 %275  ;;  %v2536_v59 = vpop.permute.xlu0 %269  ;;  %v2794_v32 = vsub.f32 %v1764_v44, %v1764_v44 }
  0xeb   : > { %vm316_vm2 = vcmp.eq.s32.totalorder %v2532_v57, %v2536_v59  ;;  %vm315_vm3 = vcmp.eq.s32.totalorder %v2510_v47, %v2536_v59  ;;  %vm320_vm5 = vcmp.eq.s32.totalorder %v2532_v57, %v2534_v58  ;;  %vm319_vm9 = vcmp.eq.s32.totalorder %v2510_v47, %v2534_v58  ;;  %3744 = vst [vmem:[#allocation34_spill] sm:$0xff] %v2730_v43 }
  0xec   : > { %vm2583_vm6 = vmpackc.low %vm316_vm2, %vm314_vm4  ;;  %v1769_v29 = vsel %vm319_vm9, 1.0, %v3644_v2  ;;  %v3639_v36 = vand.u32 4294901760, %v2642_v20  ;;  %v3640_v37 = vand.u32 4294901760, %v2644_v21  ;;  %v1765_v7 = vsel %vm315_vm3, 1.0, %v3644_v2  ;;  %3751 = vst [vmem:[#allocation37_spill] sm:$0xff] %v2794_v32 }
  0xed   : > { %v3726_v9 = vsel %vm2583_vm6, 4294967295, %v3725_v9  ;;  %1898 = vmatprep.subr.msk.bf16.mxu1 %vm2583_vm6, %v3653_v13  ;;  %1994 = vmatprep.subr.msk.bf16.mxu0 %vm2583_vm6, %v3653_v13  ;;  %vm2607_vm8 = vmpackc.low %vm315_vm3, %vm313_vm1  ;;  %v2736_v48 = vsub.f32 %v1769_v29, %v1769_v29  ;;  %v1770_v28 = vsel %vm320_vm5, 1.0, %v3644_v2  ;;  %v1766_v29 = vsel %vm316_vm2, 1.0, %v3644_v2 }
  0xee   : > { %v2561_v4 = vpop.permute.xlu1 %281  ;;  %v2563_v5 = vpop.permute.xlu0 %278  ;;  %3727 = vst [vmem:[#allocation25_spill] sm:$0xff] %v3726_v9  ;;  %v3729_v14 = vsel %vm2607_vm8, 4294967295, %v3728_v14  ;;  %vm2622_vm10 = vmpackc.low %vm320_vm5, %vm318_vm7  ;;  %1900 = vmatpush1.bf16.msk.msra.mxu1 %vm2607_vm8, %v3653_v13  ;;  %1996 = vmatpush1.bf16.msk.msra.mxu0 %vm2607_vm8, %v3653_v13  ;;  %v3748_v58 = vmov 0  ;;  %v2792_v59 = vsub.f32 %v2642_v20, %v3639_v36  ;;  %v2799_v15 = vsub.f32 %v2644_v21, %v3640_v37 }
  0xef   : > { %3730 = vst [vmem:[#allocation26_spill] sm:$0xff] %v3729_v14  ;;  %v3733_v17 = vsel %vm2622_vm10, 4294967295, %v3732_v17  ;;  %vm324_vm11 = vcmp.eq.s32.totalorder %v2532_v57, %v2561_v4  ;;  %1902 = vmatprep.subr.msk.bf16.mxu1 %vm2622_vm10, %v3653_v13  ;;  %vm3631_vm12 = vcmp.eq.s32.totalorder %v2532_v57, %v2563_v5  ;;  %1998 = vmatprep.subr.msk.bf16.mxu0 %vm2622_vm10, %v3653_v13  ;;  %vm2681_vm13 = vmpackc.low %vm319_vm9, %vm317_vm0  ;;  %v3642_v44 = vand.u32 4294901760, %v2736_v48 }
  0xf0   : > { %3734 = vst [vmem:[#allocation28_spill] sm:$0xff] %v3733_v17  ;;  %v3737_v30 = vsel %vm2681_vm13, 4294967295, %v3736_v30  ;;  %vm323_vm14 = vcmp.eq.s32.totalorder %v2510_v47, %v2561_v4  ;;  %vm321_vm15 = vcmp.eq.s32.totalorder %v2510_v47, %v2563_v5  ;;  %vm2701_vm0 = vmpackc.low %vm324_vm11, %vm3631_vm12  ;;  %v2810_v56 = vsub.f32 %v1765_v7, %v1765_v7 }
  0xf1   : > { %3738 = vst [vmem:[#allocation30_spill] sm:$0xff] %v3737_v30  ;;  %v3741_v33 = vsel %vm2701_vm0, 4294967295, %v3740_v33  ;;  %vm2749_vm7 = vmpackc.low %vm323_vm14, %vm321_vm15  ;;  %v2816_v35 = vsub.f32 %v1770_v28, %v1770_v28  ;;  %v2818_v1 = vsub.f32 %v1766_v29, %v1766_v29  ;;  %v1773_v49 = vsel %vm323_vm14, 1.0, %v3644_v2 }
  0xf2   : > { %v2651_v22 = vpop.permute.xlu1 %287  ;;  %v2653_v23 = vpop.permute.xlu0 %284  ;;  %3742 = vst [vmem:[#allocation32_spill] sm:$0xff] %v3741_v33  ;;  %1904 = vmatpush1.bf16.msk.msra.mxu1 %vm2681_vm13, %v3653_v13  ;;  %2000 = vmatpush1.bf16.msk.msra.mxu0 %vm2681_vm13, %v3653_v13  ;;  %v3746_v8 = vsel %vm2749_vm7, 4294967295, %v3745_v8  ;;  %v1774_v7 = vsel %vm324_vm11, 1.0, %v3644_v2  ;;  %v3753_v28 = vmov 0  ;;  %v1771_v34 = vsel %vm321_vm15, 1.0, %v3644_v2 }
  0xf3   : > { %vm328_vm1 = vcmp.eq.s32.totalorder %v2532_v57, %v2651_v22  ;;  %1906 = vmatprep.subr.msk.bf16.mxu1 %vm2701_vm0, %v3653_v13  ;;  %2002 = vmatprep.subr.msk.bf16.mxu0 %vm2701_vm0, %v3653_v13  ;;  %3747 = vst [vmem:[#allocation35_spill] sm:$0xff] %v3746_v8  ;;  %vm3637_vm4 = vcmp.eq.s32.totalorder %v2532_v57, %v2653_v23  ;;  %3752 = vst [vmem:[#allocation38_spill] sm:$0xff] %v2816_v35  ;;  %v3763_v0 = vand.u32 4294901760, %v2810_v56 }
  0xf4   : > { %vm327_vm3 = vcmp.eq.s32.totalorder %v2510_v47, %v2651_v22  ;;  %vm325_vm9 = vcmp.eq.s32.totalorder %v2510_v47, %v2653_v23  ;;  %vm2779_vm12 = vmpackc.low %vm328_vm1, %vm3637_vm4  ;;  %v2876_v4 = vsub.f32 %v2736_v48, %v3642_v44  ;;  %v2879_v37 = vsub.f32 %v1773_v49, %v1773_v49 }
  0xf5   : > { %v3749_v58 = vsel %vm2779_vm12, 4294967295, %v3748_v58  ;;  %vm2834_vm5 = vmpackc.low %vm327_vm3, %vm325_vm9  ;;  %v1777_v36 = vsel %vm327_vm3, 1.0, %v3644_v2  ;;  %v1775_v60 = vsel %vm325_vm9, 1.0, %v3644_v2  ;;  %v2888_v25 = vsub.f32 %v1774_v7, %v1774_v7 }
  0xf6   : > { %v2723_v38 = vpop.permute.xlu1 %293  ;;  %v2725_v40 = vpop.permute.xlu0 %290  ;;  %3750 = vst [vmem:[#allocation36_spill] sm:$0xff] %v3749_v58  ;;  %1908 = vmatpush1.bf16.msk.msra.mxu1 %vm2749_vm7, %v3653_v13  ;;  %2004 = vmatpush1.bf16.msk.msra.mxu0 %vm2749_vm7, %v3653_v13  ;;  %v3754_v28 = vsel %vm2834_vm5, 4294967295, %v3753_v28  ;;  %v2890_v61 = vsub.f32 %v1771_v34, %v1771_v34  ;;  %v3759_v49 = vmov 0  ;;  %v2913_v26 = vsub.f32 %v1777_v36, %v1777_v36 }
  0xf7   : > { %1910 = vmatprep.subr.msk.bf16.mxu1 %vm2779_vm12, %v3653_v13  ;;  %2006 = vmatprep.subr.msk.bf16.mxu0 %vm2779_vm12, %v3653_v13  ;;  %vm3648_vm2 = vcmp.eq.s32.totalorder %v2532_v57, %v2723_v38  ;;  %3755 = vst [vmem:[#allocation39_spill] sm:$0xff] %v3754_v28  ;;  %vm331_vm11 = vcmp.eq.s32.totalorder %v2510_v47, %v2723_v38  ;;  %v3762_v34 = vmov 0.0   ;;  %v3805_v9 = vand.u32 4294901760, %v2818_v1 }
  0xf8   : > { %vm329_vm14 = vcmp.eq.s32.totalorder %v2510_v47, %v2725_v40  ;;  %vm3643_vm4 = vcmp.eq.s32.totalorder %v2532_v57, %v2725_v40  ;;  %v1781_v44 = vsel %vm331_vm11, 1.0, %v3644_v2  ;;  %v2925_v24 = vsub.f32 %v1775_v60, %v1775_v60 }
  0xf9   : > { %vm2869_vm15 = vmpackc.low %vm3648_vm2, %vm3643_vm4  ;;  %v1779_v36 = vsel %vm329_vm14, 1.0, %v3762_v34  ;;  %v2940_v53 = vsub.f32 %v2810_v56, %v3763_v0  ;;  %vm3764_vm4 = vcmp.eq.s32.totalorder %v2532_v57, %v2563_v5  ;;  %v1778_v5 = vsel %vm328_vm1, 1.0, %v3762_v34 }
  0xfa   : > { %v2814_v3 = vpop.permute.xlu1 %299  ;;  %v2838_v29 = vpop.permute.xlu0 %296  ;;  %1912 = vmatpush1.bf16.msk.msra.mxu1 %vm2834_vm5, %v3653_v13  ;;  %2008 = vmatpush1.bf16.msk.msra.mxu0 %vm2834_vm5, %v3653_v13  ;;  %v3757_v11 = vsel %vm2869_vm15, 4294967295, %v3756_v11  ;;  %vm2902_vm3 = vmpackc.low %vm331_vm11, %vm329_vm14  ;;  %v3772_v0 = vmov 1.0|1.0   ;;  %vm3773_vm1 = vcmp.eq.s32.totalorder %v2532_v57, %v2653_v23  ;;  %v3774_v23 = vand.u32 4294901760, %v2879_v37 }
  0xfb   : > { %3758 = vst [vmem:[#allocation40_spill] sm:$0xff] %v3757_v11  ;;  %1914 = vmatprep.subr.msk.bf16.mxu1 %vm2869_vm15, %v3653_v13  ;;  %v3760_v49 = vsel %vm2902_vm3, 4294967295, %v3759_v49  ;;  %vm3662_vm9 = vcmp.eq.s32.totalorder %v2532_v57, %v2814_v3  ;;  %2010 = vmatprep.subr.msk.bf16.mxu0 %vm2869_vm15, %v3653_v13  ;;  %vm3661_vm11 = vcmp.eq.s32.totalorder %v2510_v47, %v2838_v29  ;;  %v1776_v60 = vsel %vm3773_vm1, 1.0, %v3762_v34 }
  0xfc   : > { %3761 = vst [vmem:[#allocation41_spill] sm:$0xff] %v3760_v49  ;;  %vm3659_vm2 = vcmp.eq.s32.totalorder %v2532_v57, %v2838_v29  ;;  %v2947_v49 = vsub.f32 %v1781_v44, %v1781_v44  ;;  %v3769_v44 = vmov 0  ;;  %v2987_v11 = vsub.f32 %v1779_v36, %v1779_v36 }
  0xfd   : > { %vm2955_vm14 = vmpackc.low %vm3662_vm9, %vm3659_vm2  ;;  %v3007_v36 = vsub.f32 %v2879_v37, %v3774_v23  ;;  %vm3775_vm9 = vcmp.eq.s32.totalorder %v2532_v57, %v2723_v38  ;;  %v3776_v28 = vand.u32 4294901760, %v2890_v61  ;;  %v3023_v58 = vsub.f32 %v1778_v5, %v1778_v5 }
  0xfe   : > { %v2917_v2 = vpop.permute.xlu1 %305  ;;  %1916 = vmatpush1.bf16.msk.msra.mxu1 %vm2902_vm3, %v3653_v13  ;;  %2012 = vmatpush1.bf16.msk.msra.mxu0 %vm2902_vm3, %v3653_v13  ;;  %v2935_v7 = vpop.permute.xlu0 %302  ;;  %v1772_v13 = vsel %vm3764_vm4, 1.0, %v3762_v34  ;;  %v3766_v52 = vsel %vm2955_vm14, 4294967295, %v3765_v52  ;;  %vm3768_vm4 = vcmp.eq.s32.totalorder %v2510_v47, %v2814_v3  ;;  %v3025_v23 = vsub.f32 %v1776_v60, %v1776_v60 }
  0xff   : > { %3767 = vst [vmem:[#allocation42_spill] sm:$0xff] %v3766_v52  ;;  %vm2972_vm2 = vmpackc.low %vm3768_vm4, %vm3661_vm11  ;;  %1918 = vmatprep.subr.msk.bf16.mxu1 %vm2955_vm14, %v3772_v0  ;;  %2014 = vmatprep.subr.msk.bf16.mxu0 %vm2955_vm14, %v3772_v0  ;;  %v2997_v52 = vsub.f32 %v1772_v13, %v1772_v13  ;;  %vm3671_vm4 = vcmp.eq.s32.totalorder %v2532_v57, %v2935_v7  ;;  %v3779_v13 = vmov 0  ;;  %v3782_v60 = vand.u32 4294901760, %v2913_v26 }
 0x100   : > { %v3770_v44 = vsel %vm2972_vm2, 4294967295, %v3769_v44  ;;  %v3021_v46 = vsub.f32 %v2890_v61, %v3776_v28  ;;  %vm3778_vm1 = vcmp.eq.s32.totalorder %v2532_v57, %v2917_v2  ;;  %v3793_v14 = vand.u32 4294901760, %v2987_v11 }
 0x101   : > { %3771 = vst [vmem:[#allocation43_spill] sm:$0xff] %v3770_v44  ;;  %v1782_v44 = vsel %vm3775_vm9, 1.0, %v3762_v34  ;;  %vm3777_vm9 = vcmp.eq.s32.totalorder %v2532_v57, %v2725_v40  ;;  %vm3037_vm11 = vmpackc.low %vm3778_vm1, %vm3671_vm4  ;;  %v3046_v5 = vsub.f32 %v2913_v26, %v3782_v60  ;;  %vm3784_vm1 = vcmp.eq.s32.totalorder %v2532_v57, %v2814_v3 }
 0x102   : > { %1920 = vmatpush1.bf16.msk.msra.mxu1 %vm2972_vm2, %v3772_v0  ;;  %2016 = vmatpush1.bf16.msk.msra.mxu0 %vm2972_vm2, %v3772_v0  ;;  %v3016_v22 = vpop.permute.xlu1 %311  ;;  %v1780_v38 = vsel %vm3777_vm9, 1.0, %v3762_v34  ;;  %v3780_v13 = vsel %vm3037_vm11, 4294967295, %v3779_v13  ;;  %v3041_v28 = vpop.permute.xlu0 %308  ;;  %vm3783_vm9 = vcmp.eq.s32.totalorder %v2510_v47, %v2814_v3  ;;  %v1786_v45 = vsel %vm3784_vm1, 1.0, %v3762_v34 }
 0x103   : > { %3781 = vst [vmem:[#allocation44_spill] sm:$0xff] %v3780_v13  ;;  %v1785_v8 = vsel %vm3783_vm9, 1.0, %v3762_v34  ;;  %vm3785_vm4 = vcmp.eq.s32.totalorder %v2510_v47, %v2935_v7  ;;  %vm3786_vm2 = vcmp.eq.s32.totalorder %v2510_v47, %v2917_v2  ;;  %v3787_v60 = vmov 0  ;;  %1922 = vmatprep.subr.msk.bf16.mxu1 %vm3037_vm11, %v3772_v0  ;;  %2018 = vmatprep.subr.msk.bf16.mxu0 %vm3037_vm11, %v3772_v0 }
 0x104   : > { %vm3063_vm14 = vmpackc.low %vm3786_vm2, %vm3785_vm4  ;;  %v640_v3 = vand.u32 4294901760, %v2940_v53  ;;  %v3790_v40 = vand.u32 4294901760, %v2925_v24  ;;  %v3079_v30 = vsub.f32 %v1782_v44, %v1782_v44  ;;  %vm344_vm2 = vcmp.eq.s32.totalorder %v2532_v57, %v3016_v22 }
 0x105   : > { %v3788_v60 = vsel %vm3063_vm14, 4294967295, %v3787_v60  ;;  %v3791_v53 = vand.u32 4294901760, %v2947_v49  ;;  %v3101_v42 = vsub.f32 %v1786_v45, %v1786_v45  ;;  %v3103_v17 = vsub.f32 %v1785_v8, %v1785_v8 }
 0x106   : > { %3789 = vst [vmem:[#allocation45_spill] sm:$0xff] %v3788_v60  ;;  %v3077_v33 = vsub.f32 %v2925_v24, %v3790_v40  ;;  %1924 = vmatpush1.bf16.msk.msra.mxu1 %vm3063_vm14, %v3772_v0  ;;  %2020 = vmatpush1.bf16.msk.msra.mxu0 %vm3063_vm14, %v3772_v0  ;;  %v3094_v40 = vsub.f32 %v1780_v38, %v1780_v38  ;;  %v3794_v45 = vmov 0  ;;  %v3800_v38 = vmov 0 }
 0x107   : > { %v3092_v13 = vsub.f32 %v2947_v49, %v3791_v53  ;;  %vm342_vm1 = vcmp.eq.s32.totalorder %v2532_v57, %v3041_v28  ;;  %v3113_v39 = vsub.f32 %v2987_v11, %v3793_v14  ;;  %vm3797_vm9 = vcmp.eq.s32.totalorder %v2532_v57, %v2838_v29 }
 0x108   : > { %vm3121_vm4 = vmpackc.low %vm344_vm2, %vm342_vm1  ;;  %v1784_v14 = vsel %vm3797_vm9, 1.0, %v3762_v34  ;;  %vm3798_vm14 = vcmp.eq.s32.totalorder %v2510_v47, %v3041_v28  ;;  %vm3799_vm11 = vcmp.eq.s32.totalorder %v2510_v47, %v3016_v22  ;;  %v3803_v8 = vand.u32 4294901760, %v2794_v32 }
 0x109   : > { %3792 = vst [vmem:[#allocation46_spill] sm:$0xff] %v3092_v13  ;;  %v3795_v45 = vsel %vm3121_vm4, 4294967295, %v3794_v45  ;;  %vm3137_vm3 = vmpackc.low %vm3799_vm11, %vm3798_vm14  ;;  %1926 = vmatprep.subr.msk.bf16.mxu1 %vm3121_vm4, %v3772_v0  ;;  %2022 = vmatprep.subr.msk.bf16.mxu0 %vm3121_vm4, %v3772_v0  ;;  %vm3804_vm11 = vcmp.eq.s32.totalorder %v2510_v47, %v2838_v29  ;;  %v633_v44 = vsub.f32 %v2818_v1, %v3805_v9  ;;  %v3808_v13 = vand.u32 4294901760, %v2568_v6 }
 0x10a   : > { %3796 = vst [vmem:[#allocation47_spill] sm:$0xff] %v3795_v45  ;;  %v3801_v38 = vsel %vm3137_vm3, 4294967295, %v3800_v38  ;;  %v621_v60 = vsub.f32 %v2794_v32, %v3803_v8  ;;  %1928 = vmatpush1.bf16.msk.msra.mxu1 %vm3137_vm3, %v3772_v0  ;;  %2024 = vmatpush1.bf16.msk.msra.mxu0 %vm3137_vm3, %v3772_v0  ;;  %v1783_v53 = vsel %vm3804_vm11, 1.0, %v3762_v34  ;;  %v3170_v63 = vsub.f32 %v1784_v14, %v1784_v14 }
 0x10b   : > { %3802 = vst [vmem:[#allocation48_spill] sm:$0xff] %v3801_v38  ;;  %v3806_v38 = vmov %v3803_v8  ;;  %v3807_v45 = vmov %v3805_v9  ;;  %v634_v8 = vand.u32 4294901760, %v633_v44  ;;  %v3809_v29 = vand.u32 4294901760, %v2515_v50 }
 0x10c   : > { %v622_v31 = vand.u32 4294901760, %v621_v60  ;;  %v2025_v0 = vpack.c.bf16 %v3807_v45, %v3806_v38  ;;  %v3810_v41 = vand.u32 4294901760, %v2644_v21  ;;  %v3811_v9 = vand.u32 4294901760, %v2810_v56 }
 0x10d   : > { %535 = vmatmul.mubr.f32.vlgmr.msra.gmra.mrb[0].mxu1 %v3808_v13  ;;  %1192 = vmatmul.mubr.f32.vlgmr.msra.gmra.mrb[0].mxu0 %v3809_v29  ;;  %v3812_v14 = vand.u32 4294901760, %v2730_v43  ;;  %v3813_v32 = vand.u32 4294901760, %v2816_v35  ;;  %v3190_v44 = vsub.f32 %v1783_v53, %v1783_v53  ;;  %vm3814_vm14 = vcmp.eq.s32.totalorder %v2510_v47, %v2917_v2 }
 0x10e   : > { %v2027_v16 = vpack.c.bf16 %v3811_v9, %v3810_v41  ;;  %v1789_v6 = vsel %vm3814_vm14, 1.0, %v3762_v34  ;;  %vm3815_vm9 = vcmp.eq.s32.totalorder %v2532_v57, %v2917_v2  ;;  %2026 = vmatprep.subr.bf16.mxu0 %v2025_v0  ;;  %540 = vmatprep.mubr.f32.mxu1 %v3762_v34  ;;  %vm3819_vm11 = vcmp.eq.s32.totalorder %v2532_v57, %v2935_v7 }
 0x10f   : > { %v645_v60 = vsub.f32 %v2730_v43, %v3812_v14  ;;  %v657_v38 = vsub.f32 %v2816_v35, %v3813_v32  ;;  %v1790_v41 = vsel %vm3815_vm9, 1.0, %v3762_v34  ;;  %v3816_v13 = vmov %v3812_v14  ;;  %1197 = vmatprep.mubr.f32.mxu0 %v3762_v34 }
 0x110   : > { %v3817_v45 = vmov %v3813_v32  ;;  %v1929_v32 = vpack.c.bf16 %v634_v8, %v622_v31  ;;  %2028 = vmatpush1.bf16.msra.mxu0 %v2027_v16  ;;  %v3818_v14 = vand.u32 4294901760, %v2997_v52  ;;  %v1788_v2 = vsel %vm3819_vm11, 1.0, %v3762_v34 }
 0x111   : > { %v2029_v29 = vpack.c.bf16 %v3817_v45, %v3816_v13  ;;  %v646_v53 = vand.u32 4294901760, %v645_v60  ;;  %v658_v9 = vand.u32 4294901760, %v657_v38  ;;  %v3820_v0 = vand.u32 4294901760, %v2799_v15 }
 0x112   : > { %v669_v50 = vsub.f32 %v2997_v52, %v3818_v14  ;;  %v3821_v31 = vand.u32 4294901760, %v2642_v20  ;;  %v3822_v16 = vand.u32 4294901760, %v2736_v48  ;;  %v3823_v60 = vand.u32 4294901760, %v2888_v25  ;;  %1930 = vmatprep.subr.bf16.mxu1 %v1929_v32 }
 0x113   : > { %v1931_v13 = vpack.c.bf16 %v640_v3, %v3820_v0  ;;  %2030 = vmatprep.subr.bf16.mxu0 %v2029_v29  ;;  %v1933_v45 = vpack.c.bf16 %v658_v9, %v646_v53  ;;  %v3824_v14 = vand.u32 4294901760, %v2590_v10  ;;  %v3825_v43 = vand.u32 4294901760, %v3025_v23 }
 0x114   : > { %v2031_v8 = vpack.c.bf16 %v3822_v16, %v3821_v31  ;;  %v681_v38 = vsub.f32 %v2888_v25, %v3823_v60  ;;  %v670_v35 = vand.u32 4294901760, %v669_v50  ;;  %v3826_v3 = vand.u32 4294901760, %v3023_v58 }
 0x115   : > { %546 = vmatmul.mubr.f32.gmra.mrb[2].mxu1 %v3824_v14  ;;  %v693_v15 = vsub.f32 %v3025_v23, %v3825_v43  ;;  %v740_v0 = vand.u32 4294901760, %v3170_v63  ;;  %v3231_v31 = vsub.f32 %v1790_v41, %v1790_v41  ;;  %v3827_v32 = vand.u32 4294901760, %v2518_v51 }
 0x116   : > { %v705_v29 = vsub.f32 %v3023_v58, %v3826_v3  ;;  %1932 = vmatpush1.bf16.msra.mxu1 %v1931_v13  ;;  %v682_v53 = vand.u32 4294901760, %v681_v38  ;;  %v3828_v10 = vand.u32 4294901760, %v2997_v52  ;;  %v3829_v50 = vmov %v3823_v60  ;;  %2032 = vmatpush1.bf16.msra.mxu0 %v2031_v8 }
 0x117   : > { %1201 = vmatmul.mubr.f32.gmra.mrb[2].mxu0 %v3827_v32  ;;  %v3704_v43 = vand.u32 4294901760, %v3190_v44  ;;  %vm3830_vm14 = vcmp.eq.s32.totalorder %v2510_v47, %v2935_v7  ;;  %v3244_v60 = vsub.f32 %v1788_v2, %v1788_v2  ;;  %v1794_v41 = vsel %vm344_vm2, 1.0, %v3762_v34  ;;  %1934 = vmatprep.subr.bf16.mxu1 %v1933_v45 }
 0x118   : > { %v2033_v9 = vpack.c.bf16 %v3829_v50, %v3828_v10  ;;  %v1787_v16 = vsel %vm3830_vm14, 1.0, %v3762_v34  ;;  %v1792_v13 = vsel %vm342_vm1, 1.0, %v3762_v34  ;;  %v3831_v38 = vand.u32 4294901760, %v2792_v59  ;;  %551 = vmatprep.mubr.f32.mxu1 %v3762_v34  ;;  %1206 = vmatprep.mubr.f32.mxu0 %v3762_v34 }
 0x119   : > { %v3832_v14 = vand.u32 4294901760, %v2876_v4  ;;  %v3833_v2 = vand.u32 4294901760, %v3094_v40  ;;  %v3834_v45 = vand.u32 4294901760, %v3079_v30  ;;  %v1937_v32 = vpack.c.bf16 %v682_v53, %v670_v35 }
 0x11a   : > { %2034 = vmatprep.subr.bf16.mxu0 %v2033_v9  ;;  %v3835_v57 = vand.u32 4294901760, %v2635_v18  ;;  %v3836_v59 = vand.u32 4294901760, %v2890_v61  ;;  %v3837_v4 = vand.u32 4294901760, %v2879_v37  ;;  %v694_v50 = vand.u32 4294901760, %v693_v15 }
 0x11b   : > { %v1935_v7 = vpack.c.bf16 %v3832_v14, %v3831_v38  ;;  %v717_v3 = vsub.f32 %v3094_v40, %v3833_v2  ;;  %v729_v8 = vsub.f32 %v3079_v30, %v3834_v45  ;;  %v706_v9 = vand.u32 4294901760, %v705_v29 }
 0x11c   : > { %557 = vmatmul.mubr.f32.gmra.mrb[4].mxu1 %v3835_v57  ;;  %v2035_v10 = vpack.c.bf16 %v3837_v4, %v3836_v59  ;;  %v3703_v38 = vand.u32 4294901760, %v3231_v31  ;;  %v3273_v14 = vsub.f32 %v1789_v6, %v1789_v6  ;;  %v3275_v2 = vsub.f32 %v1787_v16, %v1787_v16 }
 0x11d   : > { %1936 = vmatpush1.bf16.msra.mxu1 %v1935_v7  ;;  %v3838_v35 = vand.u32 4294901760, %v2525_v54  ;;  %v3839_v18 = vand.u32 4294901760, %v3025_v23  ;;  %v3840_v53 = vand.u32 4294901760, %v3023_v58  ;;  %vm3841_vm2 = vcmp.eq.s32.totalorder %v2510_v47, %v3016_v22  ;;  %562 = vmatprep.mubr.f32.mxu1 %v3762_v34 }
 0x11e   : > { %v1793_v15 = vsel %vm3841_vm2, 1.0, %v3762_v34  ;;  %v3287_v29 = vsub.f32 %v1794_v41, %v1794_v41  ;;  %vm3843_vm1 = vcmp.eq.s32.totalorder %v2510_v47, %v3041_v28  ;;  %v3293_v16 = vsub.f32 %v1792_v13, %v1792_v13  ;;  %1938 = vmatprep.subr.bf16.mxu1 %v1937_v32  ;;  %2036 = vmatpush1.bf16.msra.mxu0 %v2035_v10 }
 0x11f   : > { %1210 = vmatmul.mubr.f32.gmra.mrb[4].mxu0 %v3838_v35  ;;  %v2037_v45 = vpack.c.bf16 %v3840_v53, %v3839_v18  ;;  %v1791_v6 = vsel %vm3843_vm1, 1.0, %v3762_v34  ;;  %v3844_v7 = vand.u32 4294901760, %v3021_v46  ;;  %v3845_v57 = vand.u32 4294901760, %v3007_v36 }
 0x120   : > { %3842 = vst [vmem:[#allocation49_spill] sm:$0xff] %v3287_v29  ;;  %v3846_v22 = vand.u32 4294901760, %v2925_v24  ;;  %v3847_v41 = vand.u32 4294901760, %v2913_v26  ;;  %v718_v35 = vand.u32 4294901760, %v717_v3  ;;  %v730_v47 = vand.u32 4294901760, %v729_v8  ;;  %1215 = vmatprep.mubr.f32.mxu0 %v3762_v34 }
 0x121   : > { %v1939_v59 = vpack.c.bf16 %v3845_v57, %v3844_v7  ;;  %2038 = vmatprep.subr.bf16.mxu0 %v2037_v45  ;;  %v764_v28 = vand.u32 4294901760, %v3244_v60  ;;  %v1941_v13 = vpack.c.bf16 %v706_v9, %v694_v50  ;;  %v3848_v46 = vand.u32 4294901760, %v2640_v19 }
 0x122   : > { %v2039_v4 = vpack.c.bf16 %v3847_v41, %v3846_v22  ;;  %v741_v36 = vsub.f32 %v3170_v63, %v740_v0  ;;  %v3849_v32 = vand.u32 4294901760, %v3101_v42  ;;  %v3850_v18 = vand.u32 4294901760, %v3103_v17 }
 0x123   : > { %568 = vmatmul.mubr.f32.gmra.mrb[6].mxu1 %v3848_v46  ;;  %v747_v8 = vsub.f32 %v3190_v44, %v3704_v43  ;;  %v782_v50 = vand.u32 4294901760, %v3273_v14  ;;  %v3851_v19 = vand.u32 4294901760, %v2528_v55  ;;  %v3852_v9 = vand.u32 4294901760, %v3094_v40  ;;  %v3866_v43 = vld [vmem:[#allocation31_spill] sm:$0xff] }
 0x124   : > { %v753_v10 = vsub.f32 %v3101_v42, %v3849_v32  ;;  %v759_v3 = vsub.f32 %v3103_v17, %v3850_v18  ;;  %1940 = vmatpush1.bf16.msra.mxu1 %v1939_v59  ;;  %v3853_v53 = vand.u32 4294901760, %v3079_v30  ;;  %v770_v7 = vand.u32 4294901760, %v3275_v2  ;;  %2040 = vmatpush1.bf16.msra.mxu0 %v2039_v4 }
 0x125   : > { %1219 = vmatmul.mubr.f32.gmra.mrb[6].mxu0 %v3851_v19  ;;  %v800_v57 = vand.u32 4294901760, %v3287_v29  ;;  %v3329_v22 = vsub.f32 %v1793_v15, %v1793_v15  ;;  %v3331_v41 = vsub.f32 %v1791_v6, %v1791_v6  ;;  %1942 = vmatprep.subr.bf16.mxu1 %v1941_v13  ;;  %v788_v59 = vand.u32 4294901760, %v3293_v16 }
 0x126   : > { %v2041_v45 = vpack.c.bf16 %v3853_v53, %v3852_v9  ;;  %v3854_v46 = vand.u32 4294901760, %v3077_v33  ;;  %v3855_v32 = vand.u32 4294901760, %v3046_v5  ;;  %v1945_v19 = vpack.c.bf16 %v730_v47, %v718_v35  ;;  %573 = vmatprep.mubr.f32.mxu1 %v3762_v34  ;;  %1224 = vmatprep.mubr.f32.mxu0 %v3762_v34 }
 0x127   : > { %v3856_v9 = vand.u32 4294901760, %v2987_v11  ;;  %v3857_v15 = vand.u32 4294901760, %v2947_v49  ;;  %v3858_v6 = vand.u32 4294901760, %v2667_v27  ;;  %v742_v4 = vand.u32 4294901760, %v741_v36  ;;  %v3861_v36 = vld [vmem:[#allocation33_spill] sm:$0xff] }
 0x128   : > { %v1943_v18 = vpack.c.bf16 %v3855_v32, %v3854_v46  ;;  %2042 = vmatprep.subr.bf16.mxu0 %v2041_v45  ;;  %v754_v13 = vand.u32 4294901760, %v753_v10  ;;  %v765_v33 = vsub.f32 %v3244_v60, %v764_v28  ;;  %v777_v5 = vsub.f32 %v3231_v31, %v3703_v38 }
 0x129   : > { %v2043_v53 = vpack.c.bf16 %v3857_v15, %v3856_v9  ;;  %579 = vmatmul.mubr.f32.gmra.mrb[8].mxu1 %v3858_v6  ;;  %v760_v35 = vand.u32 4294901760, %v759_v3  ;;  %v3859_v47 = vand.u32 4294901760, %v2541_v62  ;;  %v3860_v45 = vand.u32 4294901760, %v3101_v42 }
 0x12a   : > { %1944 = vmatpush1.bf16.msra.mxu1 %v1943_v18  ;;  %v600_v27 = vand.u32 4294901760, %v2759_v12  ;;  %v3862_v10 = vand.u32 4294901760, %v3861_v36  ;;  %v748_v9 = vand.u32 4294901760, %v747_v8  ;;  %v783_v15 = vsub.f32 %v3273_v14, %v782_v50  ;;  %584 = vmatprep.mubr.f32.mxu1 %v3762_v34 }
 0x12b   : > { %1228 = vmatmul.mubr.f32.gmra.mrb[8].mxu0 %v3859_v47  ;;  %v2045_v46 = vpack.c.bf16 %v3860_v45, %v740_v0  ;;  %v771_v3 = vsub.f32 %v3275_v2, %v770_v7  ;;  %v806_v18 = vand.u32 4294901760, %v3329_v22  ;;  %1946 = vmatprep.subr.bf16.mxu1 %v1945_v19  ;;  %v801_v6 = vsub.f32 %v3287_v29, %v800_v57  ;;  %v3864_v45 = vld [vmem:[#allocation46_spill] sm:$0xff] }
 0x12c   : > { %v610_v32 = vsub.f32 %v3861_v36, %v3862_v10  ;;  %2044 = vmatpush1.bf16.msra.mxu0 %v2043_v53  ;;  %v789_v47 = vsub.f32 %v3293_v16, %v788_v59  ;;  %v794_v0 = vand.u32 4294901760, %v3331_v41  ;;  %v3863_v12 = vand.u32 4294901760, %v3113_v39  ;;  %1233 = vmatprep.mubr.f32.mxu0 %v3762_v34  ;;  %v3870_v39 = vld [vmem:[#allocation23_spill] sm:$0xff] }
 0x12d   : > { %v3865_v38 = vand.u32 4294901760, %v3864_v45  ;;  %2046 = vmatprep.subr.bf16.mxu0 %v2045_v46  ;;  %v1949_v8 = vpack.c.bf16 %v754_v13, %v742_v4  ;;  %v3867_v19 = vand.u32 4294901760, %v3866_v43  ;;  %v3868_v53 = vand.u32 4294901760, %v3190_v44 }
 0x12e   : > { %v3869_v62 = vand.u32 4294901760, %v3103_v17  ;;  %v766_v54 = vand.u32 4294901760, %v765_v33  ;;  %v778_v51 = vand.u32 4294901760, %v777_v5  ;;  %v3871_v45 = vand.u32 4294901760, %v3870_v39 }
 0x12f   : > { %v1947_v10 = vpack.c.bf16 %v3865_v38, %v3863_v12  ;;  %590 = vmatmul.mubr.f32.gmra.mrb[10].mxu1 %v3867_v19  ;;  %v3872_v38 = vand.u32 4294901760, %v3231_v31  ;;  %v784_v4 = vand.u32 4294901760, %v783_v15  ;;  %v611_v13 = vand.u32 4294901760, %v610_v32  ;;  %v3873_v15 = vld [vmem:[#allocation27_spill] sm:$0xff] }
 0x130   : > { %v2047_v55 = vpack.c.bf16 %v3869_v62, %v3868_v53  ;;  %1237 = vmatmul.mubr.f32.gmra.mrb[10].mxu0 %v3871_v45  ;;  %v772_v43 = vand.u32 4294901760, %v771_v3  ;;  %v807_v12 = vsub.f32 %v3329_v22, %v806_v18  ;;  %v795_v19 = vsub.f32 %v3331_v41, %v794_v0  ;;  %595 = vmatprep.mubr.f32.mxu1 %v3762_v34  ;;  %v3884_v53 = vld [vmem:[#allocation13_spill] sm:$0xff] }
 0x131   : > { %1948 = vmatpush1.bf16.msra.mxu1 %v1947_v10  ;;  %v2049_v46 = vpack.c.bf16 %v3872_v38, %v764_v28  ;;  %v1951_v29 = vpack.c.bf16 %v760_v35, %v748_v9  ;;  %v1953_v62 = vpack.c.bf16 %v778_v51, %v766_v54  ;;  %1242 = vmatprep.mubr.f32.mxu0 %v3762_v34  ;;  %v790_v5 = vand.u32 4294901760, %v789_v47  ;;  %v3879_v9 = vld [vmem:[#allocation12_spill] sm:$0xff] }
 0x132   : > { %1950 = vmatprep.subr.bf16.mxu1 %v1949_v8  ;;  %2048 = vmatpush1.bf16.msra.mxu0 %v2047_v55  ;;  %v2051_v33 = vpack.c.bf16 %v782_v50, %v770_v7  ;;  %v802_v28 = vand.u32 4294901760, %v801_v6  ;;  %v3874_v55 = vand.u32 4294901760, %v3873_v15  ;;  %v2053_v32 = vpack.c.bf16 %v800_v57, %v788_v59  ;;  %v3878_v59 = vld [vmem:[#allocation37_spill] sm:$0xff] }
 0x133   : > { %2050 = vmatprep.subr.bf16.mxu0 %v2049_v46  ;;  %601 = vmatmul.mubr.f32.gmra.mrb[12].mxu1 %v600_v27  ;;  %v808_v3 = vand.u32 4294901760, %v807_v12  ;;  %v796_v10 = vand.u32 4294901760, %v795_v19  ;;  %v1955_v35 = vpack.c.bf16 %v784_v4, %v772_v43  ;;  %v2055_v54 = vpack.c.bf16 %v806_v18, %v794_v0  ;;  %v3883_v0 = vld [vmem:[#allocation38_spill] sm:$0xff]  ;;  %v3899_v43 = vld [vmem:[#allocation43_spill] sm:$0xff]  ;;  %v3904_v12 = vld [vmem:[#allocation45_spill] sm:$0xff] }
 0x134   : > { %1246 = vmatmul.mubr.f32.gmra.mrb[12].mxu0 %v3874_v55  ;;  %606 = vmatprep.mubr.f32.mxu1 %v3762_v34  ;;  %v1957_v51 = vpack.c.bf16 %v802_v28, %v790_v5  ;;  %v3876_v7 = vmov 1.0|1.0   ;;  %v1961_v27 = vpack.c.bf16 %v2818_v1, %v3878_v59  ;;  %v1963_v6 = vpack.c.bf16 %v2810_v56, %v2644_v21  ;;  %v3882_v1 = vld [vmem:[#allocation34_spill] sm:$0xff]  ;;  %v412_v59 = vld [vmem:[%s2458_s18 + $0x18] sm:$0xff] }
 0x135   : > { %1952 = vmatpush1.bf16.msra.mxu1 %v1951_v29  ;;  %1251 = vmatprep.mubr.f32.mxu0 %v3762_v34  ;;  %v3875_v29 = vand.u32 4294901760, %v3861_v36  ;;  %v1959_v50 = vpack.c.bf16 %v808_v3, %v796_v10  ;;  %v1965_v8 = vpack.c.bf16 %v3883_v0, %v3882_v1  ;;  %v1967_v21 = vpack.c.bf16 %v2736_v48, %v2642_v20  ;;  %v3887_v20 = vld [vmem:[#allocation14_spill] sm:$0xff]  ;;  %v413_v0 = vld [vmem:[%s2458_s18 + $0x20] sm:$0xff] }
 0x136   : > { %1954 = vmatprep.subr.bf16.mxu1 %v1953_v62  ;;  %2052 = vmatpush1.bf16.msra.mxu0 %v2051_v33  ;;  %v1969_v45 = vpack.c.bf16 %v2888_v25, %v2997_v52  ;;  %v1971_v48 = vpack.c.bf16 %v2879_v37, %v2890_v61  ;;  %v1973_v52 = vpack.c.bf16 %v3023_v58, %v3025_v23  ;;  %v3890_v61 = vld [vmem:[#allocation15_spill] sm:$0xff]  ;;  %v3913_v33 = vld [vmem:[#allocation21_spill] sm:$0xff]  ;;  %v3914_v5 = vld [vmem:[#allocation22_spill] sm:$0xff] }
 0x137   : > { %2054 = vmatprep.subr.bf16.mxu0 %v2053_v32  ;;  %612 = vmatmul.mubr.f32.gmra.mrb[14].mxu1 %v611_v13  ;;  %v1975_v37 = vpack.c.bf16 %v2913_v26, %v2925_v24  ;;  %v1977_v58 = vpack.c.bf16 %v3079_v30, %v3094_v40  ;;  %v3893_v24 = vld [vmem:[#allocation18_spill] sm:$0xff]  ;;  %v1979_v26 = vpack.c.bf16 %v2947_v49, %v2987_v11  ;;  %v3894_v13 = vld [vmem:[#allocation41_spill] sm:$0xff]  ;;  %v3898_v11 = vld [vmem:[#allocation19_spill] sm:$0xff] }
 0x138   : > { %1255 = vmatmul.mubr.f32.gmra.mrb[14].mxu0 %v3875_v29  ;;  %842 = vmatprep.mubr.f32.mxu1 %v3762_v34  ;;  %v1981_v30 = vpack.c.bf16 %v3101_v42, %v3170_v63  ;;  %v3896_v40 = vld [vmem:[#allocation42_spill] sm:$0xff]  ;;  %v1983_v49 = vpack.c.bf16 %v3103_v17, %v3190_v44  ;;  %v1985_v42 = vpack.c.bf16 %v3231_v31, %v3244_v60  ;;  %v3901_v63 = vld [vmem:[#allocation44_spill] sm:$0xff]  ;;  %v3906_v31 = vld [vmem:[#allocation49_spill] sm:$0xff] }
 0x139   : > { %1956 = vmatpush1.bf16.msra.mxu1 %v1955_v35  ;;  %1421 = vmatprep.mubr.f32.mxu0 %v3762_v34  ;;  %v3903_v17 = vld [vmem:[#allocation24_spill] sm:$0xff]  ;;  %v1987_v44 = vpack.c.bf16 %v3273_v14, %v3275_v2  ;;  %v1989_v60 = vpack.c.bf16 %v3906_v31, %v3293_v16  ;;  %v3908_v14 = vld [vmem:[#allocation29_spill] sm:$0xff]  ;;  %v1991_v2 = vpack.c.bf16 %v3329_v22, %v3331_v41  ;;  %v419_v31 = vld [vmem:[%s2458_s18 + $0x50] sm:$0xff] }
 0x13a   : > { %1958 = vmatprep.subr.bf16.mxu1 %v1957_v51  ;;  %2056 = vmatpush1.bf16.msra.mxu0 %v2055_v54  ;;  %v3910_v16 = vld [vmem:[#allocation16_spill] sm:$0xff]  ;;  %v3911_v22 = vld [vmem:[#allocation17_spill] sm:$0xff] }
 0x13b   : > { %2058 = vmatprep.subr.msk.bf16.mxu0 %vm2583_vm6, %v3876_v7  ;;  %vm3895_vm6 = vnez %v3894_v13  ;;  %v3912_v41 = vld [vmem:[#allocation20_spill] sm:$0xff]  ;;  %v410_v35 = vld [vmem:[%s2458_s18 + $0x8] sm:$0xff] }
 0x13c   : > { %v409_v32 = vld [vmem:[%s2458_s18] sm:$0xff] }
 0x13d   : > { %1960 = vmatpush1.bf16.msra.mxu1 %v1959_v50  ;;  %1423 = vmatmul.mubr.f32.vlgmr.msra.gmra.mrb[0].mxu0 %v3879_v9 }
 0x13e   : > { %1962 = vmatprep.subr.bf16.mxu1 %v1961_v27  ;;  %2060 = vmatpush1.bf16.msk.msra.mxu0 %vm2607_vm8, %v3876_v7  ;;  %vm3897_vm8 = vnez %v3896_v40 }
 0x13f   : > { %2062 = vmatprep.subr.msk.bf16.mxu0 %vm2622_vm10, %v3876_v7  ;;  %1428 = vmatprep.mubr.f32.mxu0 %v3762_v34  ;;  %vm3900_vm10 = vnez %v3899_v43 }
 0x140   : > { %844 = vmatmul.mubr.f32.vlgmr.msra.gmra.mrb[0].mxu1 %v3879_v9 }
 0x141   : > { %1964 = vmatpush1.bf16.msra.mxu1 %v1963_v6  ;;  %849 = vmatprep.mubr.f32.mxu1 %v3762_v34 }
 0x142   : > { %1966 = vmatprep.subr.bf16.mxu1 %v1965_v8  ;;  %1430 = vmatmul.mubr.f32.gmra.mrb[2].mxu0 %v3884_v53 }
 0x143   : > { %2064 = vmatpush1.bf16.msk.msra.mxu0 %vm2681_vm13, %v3876_v7  ;;  %1435 = vmatprep.mubr.f32.mxu0 %v3762_v34  ;;  %vm3905_vm13 = vnez %v3904_v12 }
 0x144   : > { %851 = vmatmul.mubr.f32.gmra.mrb[2].mxu1 %v3884_v53  ;;  %2066 = vmatprep.subr.msk.bf16.mxu0 %vm2701_vm0, %v3876_v7 }
 0x145   : > { %1968 = vmatpush1.bf16.msra.mxu1 %v1967_v21  ;;  %856 = vmatprep.mubr.f32.mxu1 %v3762_v34  ;;  %v414_v21 = vld [vmem:[%s2458_s18 + $0x28] sm:$0xff] }
 0x146   : > { %1970 = vmatprep.subr.bf16.mxu1 %v1969_v45  ;;  %1437 = vmatmul.mubr.f32.gmra.mrb[4].mxu0 %v3887_v20 }
 0x147   : > { %2068 = vmatpush1.bf16.msk.msra.mxu0 %vm2749_vm7, %v3876_v7  ;;  %1442 = vmatprep.mubr.f32.mxu0 %v3762_v34 }
 0x148   : > { %858 = vmatmul.mubr.f32.gmra.mrb[4].mxu1 %v3887_v20  ;;  %2070 = vmatprep.subr.msk.bf16.mxu0 %vm2779_vm12, %v3876_v7  ;;  %vm3902_vm12 = vnez %v3901_v63 }
 0x149   : > { %1972 = vmatpush1.bf16.msra.mxu1 %v1971_v48  ;;  %863 = vmatprep.mubr.f32.mxu1 %v3762_v34 }
 0x14a   : > { %1974 = vmatprep.subr.bf16.mxu1 %v1973_v52  ;;  %1444 = vmatmul.mubr.f32.gmra.mrb[6].mxu0 %v3890_v61  ;;  %v415_v52 = vld [vmem:[%s2458_s18 + $0x30] sm:$0xff] }
 0x14b   : > { %2072 = vmatpush1.bf16.msk.msra.mxu0 %vm2834_vm5, %v3876_v7  ;;  %1449 = vmatprep.mubr.f32.mxu0 %v3762_v34 }
 0x14c   : > { %865 = vmatmul.mubr.f32.gmra.mrb[6].mxu1 %v3890_v61  ;;  %2074 = vmatprep.subr.msk.bf16.mxu0 %vm2869_vm15, %v3876_v7 }
 0x14d   : > { %1976 = vmatpush1.bf16.msra.mxu1 %v1975_v37  ;;  %870 = vmatprep.mubr.f32.mxu1 %v3762_v34  ;;  %v416_v37 = vld [vmem:[%s2458_s18 + $0x38] sm:$0xff] }
 0x14e   : > { %1978 = vmatprep.subr.bf16.mxu1 %v1977_v58  ;;  %1451 = vmatmul.mubr.f32.gmra.mrb[8].mxu0 %v3893_v24 }
 0x14f   : > { %2076 = vmatpush1.bf16.msk.msra.mxu0 %vm3895_vm6, %v3876_v7  ;;  %1456 = vmatprep.mubr.f32.mxu0 %v3762_v34 }
 0x150   : > { %872 = vmatmul.mubr.f32.gmra.mrb[8].mxu1 %v3893_v24  ;;  %2078 = vmatprep.subr.msk.bf16.mxu0 %vm3897_vm8, %v3876_v7 }
 0x151   : > { %1980 = vmatpush1.bf16.msra.mxu1 %v1979_v26  ;;  %877 = vmatprep.mubr.f32.mxu1 %v3762_v34 }
 0x152   : > { %1982 = vmatprep.subr.bf16.mxu1 %v1981_v30  ;;  %1458 = vmatmul.mubr.f32.gmra.mrb[10].mxu0 %v3898_v11  ;;  %v417_v30 = vld [vmem:[%s2458_s18 + $0x40] sm:$0xff] }
 0x153   : > { %2080 = vmatpush1.bf16.msk.msra.mxu0 %vm3900_vm10, %v3876_v7  ;;  %1463 = vmatprep.mubr.f32.mxu0 %v3762_v34 }
 0x154   : > { %879 = vmatmul.mubr.f32.gmra.mrb[10].mxu1 %v3898_v11  ;;  %2082 = vmatprep.subr.msk.bf16.mxu0 %vm3902_vm12, %v3876_v7 }
 0x155   : > { %1984 = vmatpush1.bf16.msra.mxu1 %v1983_v49  ;;  %884 = vmatprep.mubr.f32.mxu1 %v3762_v34  ;;  %v418_v49 = vld [vmem:[%s2458_s18 + $0x48] sm:$0xff] }
 0x156   : > { %1986 = vmatprep.subr.bf16.mxu1 %v1985_v42  ;;  %1465 = vmatmul.mubr.f32.gmra.mrb[12].mxu0 %v3903_v17 }
 0x157   : > { %2084 = vmatpush1.bf16.msk.msra.mxu0 %vm3905_vm13, %v3876_v7  ;;  %1470 = vmatprep.mubr.f32.mxu0 %v3762_v34 }
 0x158   : > { %886 = vmatmul.mubr.f32.gmra.mrb[12].mxu1 %v3903_v17  ;;  %2086 = vmatprep.subr.msk.bf16.mxu0 %vm3121_vm4, %v3876_v7 }
 0x159   : > { %1988 = vmatpush1.bf16.msra.mxu1 %v1987_v44  ;;  %891 = vmatprep.mubr.f32.mxu1 %v3762_v34 }
 0x15a   : > { %1990 = vmatprep.subr.bf16.mxu1 %v1989_v60  ;;  %1472 = vmatmul.mubr.f32.gmra.mrb[14].mxu0 %v3908_v14 }
 0x15b   : > { %2088 = vmatpush1.bf16.msk.msra.mxu0 %vm3137_vm3, %v3876_v7  ;;  %1574 = vmatprep.mubr.f32.mxu0 %v3762_v34  ;;  %v411_v7 = vld [vmem:[%s2458_s18 + $0x10] sm:$0xff] }
 0x15c   : > { %893 = vmatmul.mubr.f32.gmra.mrb[14].mxu1 %v3908_v14 }
 0x15d   : > { %1992 = vmatpush1.bf16.msra.mxu1 %v1991_v2  ;;  %1027 = vmatprep.mubr.f32.mxu1 %v3762_v34 }
 0x15e   : > { %1576 = vmatmul.mubr.f32.vlgmr.msra.gmra.mrb[0].mxu0 %v3879_v9 }
 0x15f   : > { %1581 = vmatprep.mubr.f32.mxu0 %v3762_v34 }
 0x160   : > { %1030 = vmatmul.mubr.f32.vlgmr.msra.gmra.mrb[0].mxu1 %v3910_v16 }
 0x161   : > { %1035 = vmatprep.mubr.f32.mxu1 %v3762_v34 }
 0x162   : > { %1583 = vmatmul.mubr.f32.gmra.mrb[2].mxu0 %v3884_v53 }
 0x163   : > { %1588 = vmatprep.mubr.f32.mxu0 %v3762_v34 }
 0x164   : > { %1038 = vmatmul.mubr.f32.gmra.mrb[2].mxu1 %v3911_v22 }
 0x165   : > { %1043 = vmatprep.mubr.f32.mxu1 %v3762_v34 }
 0x166   : > { %1590 = vmatmul.mubr.f32.gmra.mrb[4].mxu0 %v3887_v20 }
 0x167   : > { %1595 = vmatprep.mubr.f32.mxu0 %v3762_v34 }
 0x168   : > { %1046 = vmatmul.mubr.f32.gmra.mrb[4].mxu1 %v3912_v41 }
 0x169   : > { %1051 = vmatprep.mubr.f32.mxu1 %v3762_v34 }
 0x16a   : > { %1597 = vmatmul.mubr.f32.gmra.mrb[6].mxu0 %v3890_v61 }
 0x16b   : > { %1602 = vmatprep.mubr.f32.mxu0 %v3762_v34 }
 0x16c   : > { %1054 = vmatmul.mubr.f32.gmra.mrb[6].mxu1 %v3913_v33 }
 0x16d   : > { %1059 = vmatprep.mubr.f32.mxu1 %v3762_v34 }
 0x16e   : > { %1604 = vmatmul.mubr.f32.gmra.mrb[8].mxu0 %v3893_v24 }
 0x16f   : > { %1609 = vmatprep.mubr.f32.mxu0 %v3762_v34 }
 0x170   : > { %1062 = vmatmul.mubr.f32.gmra.mrb[8].mxu1 %v3914_v5  ;;  %v421_v5 = vld [vmem:[%s2458_s18 + $0x60] sm:$0xff] }
 0x171   : > { %1067 = vmatprep.mubr.f32.mxu1 %v3762_v34 }
 0x172   : > { %1611 = vmatmul.mubr.f32.gmra.mrb[10].mxu0 %v3898_v11 }
 0x173   : > { %1616 = vmatprep.mubr.f32.mxu0 %v3762_v34 }
 0x174   : > { %1070 = vmatmul.mubr.f32.gmra.mrb[10].mxu1 %v3870_v39 }
 0x175   : > { %1075 = vmatprep.mubr.f32.mxu1 %v3762_v34 }
 0x176   : > { %1618 = vmatmul.mubr.f32.gmra.mrb[12].mxu0 %v3903_v17 }
 0x177   : > { %1623 = vmatprep.mubr.f32.mxu0 %v3762_v34 }
 0x178   : > { %1078 = vmatmul.mubr.f32.gmra.mrb[12].mxu1 %v3873_v15 }
 0x179   : > { %1083 = vmatprep.mubr.f32.mxu1 %v3762_v34 }
 0x17a   : > { %1625 = vmatmul.mubr.f32.gmra.mrb[14].mxu0 %v3908_v14  ;;  %v420_v14 = vld [vmem:[%s2458_s18 + $0x58] sm:$0xff] }
 0x17c   : > { %1086 = vmatmul.mubr.f32.gmra.mrb[14].mxu1 %v3861_v36 }
 0x231   : > { %v1577_v28 = vpop.f32.mrb[0].mxu0 }
 0x232   : > { %v1579_v55 = vpop.f32.mrb[1].mxu0 }
 0x233   : > { %v1031_v39 = vpop.f32.mrb[0].mxu1 }
 0x234   : > { %v2089_v3 = vadd.f32 %v1577_v28, %v1031_v39  ;;  %v1033_v10 = vpop.f32.mrb[1].mxu1  ;;  %v422_v39 = vld [vmem:[%s2458_s18 + $0x68] sm:$0xff] }
 0x235   : > { %v2090_v51 = vadd.f32 %v1579_v55, %v1033_v10  ;;  %v1584_v54 = vpop.f32.mrb[2].mxu0 }
 0x236   : > { %v1631_v15 = vadd.f32 %v2089_v3, %v409_v32  ;;  %v1586_v34 = vpop.f32.mrb[3].mxu0 }
 0x237   : > { %v1632_v29 = vadd.f32 %v2090_v51, %v410_v35  ;;  %v1039_v50 = vpop.f32.mrb[2].mxu1 }
 0x238   : > { %1647 = vst [vmem:[%s2458_s18] sm:$0xff] %v1631_v15  ;;  %v2091_v36 = vadd.f32 %v1584_v54, %v1039_v50  ;;  %v1041_v57 = vpop.f32.mrb[3].mxu1  ;;  %v423_v15 = vld [vmem:[%s2458_s18 + $0x70] sm:$0xff]  ;;  %v424_v50 = vld [vmem:[%s2458_s18 + $0x78] sm:$0xff] }
 0x239   : > { %1648 = vst [vmem:[%s2458_s18 + $0x8] sm:$0xff] %v1632_v29  ;;  %v2092_v27 = vadd.f32 %v1586_v34, %v1041_v57  ;;  %v1591_v9 = vpop.f32.mrb[4].mxu0 }
 0x23a   : > { %v1633_v18 = vadd.f32 %v2091_v36, %v411_v7  ;;  %v1593_v6 = vpop.f32.mrb[5].mxu0 }
 0x23b   : > { %v1634_v47 = vadd.f32 %v2092_v27, %v412_v59  ;;  %v1047_v1 = vpop.f32.mrb[4].mxu1 }
 0x23c   : > { %1649 = vst [vmem:[%s2458_s18 + $0x10] sm:$0xff] %v1633_v18  ;;  %v2093_v8 = vadd.f32 %v1591_v9, %v1047_v1  ;;  %v1049_v53 = vpop.f32.mrb[5].mxu1 }
 0x23d   : > { %1650 = vst [vmem:[%s2458_s18 + $0x18] sm:$0xff] %v1634_v47  ;;  %v2094_v56 = vadd.f32 %v1593_v6, %v1049_v53  ;;  %v1598_v45 = vpop.f32.mrb[6].mxu0 }
 0x23e   : > { %v1635_v38 = vadd.f32 %v2093_v8, %v413_v0  ;;  %v1600_v20 = vpop.f32.mrb[7].mxu0 }
 0x23f   : > { %v1636_v48 = vadd.f32 %v2094_v56, %v414_v21  ;;  %v1055_v46 = vpop.f32.mrb[6].mxu1 }
 0x240   : > { %1651 = vst [vmem:[%s2458_s18 + $0x20] sm:$0xff] %v1635_v38  ;;  %v2095_v25 = vadd.f32 %v1598_v45, %v1055_v46  ;;  %v1057_v61 = vpop.f32.mrb[7].mxu1 }
 0x241   : > { %1652 = vst [vmem:[%s2458_s18 + $0x28] sm:$0xff] %v1636_v48  ;;  %v2096_v4 = vadd.f32 %v1600_v20, %v1057_v61  ;;  %v1605_v58 = vpop.f32.mrb[8].mxu0 }
 0x242   : > { %v1637_v23 = vadd.f32 %v2095_v25, %v415_v52  ;;  %v1607_v24 = vpop.f32.mrb[9].mxu0 }
 0x243   : > { %v1638_v26 = vadd.f32 %v2096_v4, %v416_v37  ;;  %v1063_v13 = vpop.f32.mrb[8].mxu1 }
 0x244   : > { %1653 = vst [vmem:[%s2458_s18 + $0x30] sm:$0xff] %v1637_v23  ;;  %v2097_v40 = vadd.f32 %v1605_v58, %v1063_v13  ;;  %v1065_v11 = vpop.f32.mrb[9].mxu1 }
 0x245   : > { %1654 = vst [vmem:[%s2458_s18 + $0x38] sm:$0xff] %v1638_v26  ;;  %v2098_v43 = vadd.f32 %v1607_v24, %v1065_v11  ;;  %v1612_v42 = vpop.f32.mrb[10].mxu0 }
 0x246   : > { %v1639_v63 = vadd.f32 %v2097_v40, %v417_v30  ;;  %v1614_v17 = vpop.f32.mrb[11].mxu0 }
 0x247   : > { %v1640_v44 = vadd.f32 %v2098_v43, %v418_v49  ;;  %v1071_v12 = vpop.f32.mrb[10].mxu1 }
 0x248   : > { %1655 = vst [vmem:[%s2458_s18 + $0x40] sm:$0xff] %v1639_v63  ;;  %v2099_v60 = vadd.f32 %v1612_v42, %v1071_v12  ;;  %v1073_v19 = vpop.f32.mrb[11].mxu1 }
 0x249   : > { %1656 = vst [vmem:[%s2458_s18 + $0x48] sm:$0xff] %v1640_v44  ;;  %v2100_v2 = vadd.f32 %v1614_v17, %v1073_v19  ;;  %v1619_v62 = vpop.f32.mrb[12].mxu0 }
 0x24a   : > { %v1641_v16 = vadd.f32 %v2099_v60, %v419_v31  ;;  %v1621_v22 = vpop.f32.mrb[13].mxu0 }
 0x24b   : > { %v1642_v41 = vadd.f32 %v2100_v2, %v420_v14  ;;  %v1079_v33 = vpop.f32.mrb[12].mxu1 }
 0x24c   : > { %1657 = vst [vmem:[%s2458_s18 + $0x50] sm:$0xff] %v1641_v16  ;;  %v2101_v28 = vadd.f32 %v1619_v62, %v1079_v33  ;;  %v1081_v55 = vpop.f32.mrb[13].mxu1 }
 0x24d   : > { %1658 = vst [vmem:[%s2458_s18 + $0x58] sm:$0xff] %v1642_v41  ;;  %v2102_v32 = vadd.f32 %v1621_v22, %v1081_v55  ;;  %v1626_v3 = vpop.f32.mrb[14].mxu0 }
 0x24e   : > { %v1643_v10 = vadd.f32 %v2101_v28, %v421_v5  ;;  %v1628_v35 = vpop.f32.mrb[15].mxu0 }
 0x24f   : > { %v1644_v51 = vadd.f32 %v2102_v32, %v422_v39  ;;  %v1087_v54 = vpop.f32.mrb[14].mxu1 }
 0x250   : > { %1659 = vst [vmem:[%s2458_s18 + $0x60] sm:$0xff] %v1643_v10  ;;  %v2103_v34 = vadd.f32 %v1626_v3, %v1087_v54  ;;  %v1089_v29 = vpop.f32.mrb[15].mxu1 }
 0x251   : > { %1660 = vst [vmem:[%s2458_s18 + $0x68] sm:$0xff] %v1644_v51  ;;  %v2104_v7 = vadd.f32 %v1628_v35, %v1089_v29 }
 0x252   : > { %v1645_v36 = vadd.f32 %v2103_v34, %v423_v15 }
 0x253   : > { %v1646_v57 = vadd.f32 %v2104_v7, %v424_v50 }
 0x254   : > { %1661 = vst [vmem:[%s2458_s18 + $0x70] sm:$0xff] %v1645_v36 }
 0x255   : > { %1662 = vst [vmem:[%s2458_s18 + $0x78] sm:$0xff] %v1646_v57 }
 0x256 PF: > { %s2169_s25 = scalar_select %p2428_p10, [#allocation3], [#allocation9] }
 0x257   : > { %s3924_s17 = smov (!%p2428_p10, %s2415_s17), 0  ;;  %s1678_s29 = sshll.u32 %s2458_s18, 4  ;;  %s3574_s29 = int_to_ptr.vmem [resolvable:$true] %s1678_s29 }
 0x258   : > { %s1671_s28 = sld [smem:[%s2169_s25 + %s3924_s17]]  ;;  %s3583_s8 = scalar_lea.sflag [#allocation8], %s182_s27 }
 0x259   : > { %s2270_s9 = scalar_lea.vmem %s3574_s29, 2048  ;;  %s2344_s17 = smov [#allocation7]  }
 0x25a   : > { %p2271_p6 = scmp.ne.s32.totalorder %s3574_s29, %s2270_s9  ;;  %s2274_s10 = sshll.u32 %s2344_s17, 4  ;;  %s2275_s10 = int_to_ptr.vmem [resolvable:$false] %s2274_s10 }
 0x25b   : > { %s2276_s11 = scalar_lea.vmem %s2275_s10, 4096  ;;  %p2277_p9 = scmp.lt.s32.totalorder %s3574_s29, %s2275_s10 }
 0x25c   : > { %p2272_p7 = pnand %p2271_p6, %p2428_p10  ;;  %p2278_p11 = scmp.lt.s32.totalorder %s2276_s11, %s2270_s9 }
 0x25e   : > { %s1896_s0 = sshll.u32 %s1671_s28, 8  ;;  %p2273_p8 = pneg %p2272_p7 }
 0x25f   : > { %s3579_s7 = scalar_lea.hbm %s3627_s6, %s1896_s0  ;;  %p2279_p13 = por %p2278_p11, %p2277_p9 }
 0x261   : > { %p2280_p0 = pnand %p2279_p13, %p2273_p8 }
 0x263   : > { %2283 = shalt.err (!%p2280_p0)
}
 0x264   : > { %s2284_s27 = scalar_lea.hbm %s3579_s7, 2048  ;;  %s2288_s2 = scalar_lea.hbm %s3627_s6, 2048 }
 0x265   : > { %p2285_p1 = scmp.ne.s32.totalorder %s3579_s7, %s2284_s27  ;;  %p2289_p4 = scmp.lt.u32.totalorder %s3579_s7, %s3627_s6 }
 0x266   : > { %p2290_p5 = scmp.lt.u32.totalorder %s2288_s2, %s2284_s27  ;;  %p2292_p7 = scmp.lt.u32.totalorder %s2284_s27, %s3579_s7 }
 0x267   : > { %p2286_p2 = pnand %p2285_p1, %p2428_p10 }
 0x268   : > { %p2291_p6 = por %p2290_p5, %p2289_p4 }
 0x269   : > { %p2287_p3 = pneg %p2286_p2 }
 0x26a   : > { %p2293_p8 = por %p2292_p7, %p2291_p6 }
 0x26c   : > { %p2294_p9 = pnand %p2293_p8, %p2287_p3 }
 0x26e   : > { %2297 = shalt.err (!%p2294_p9)
}
 0x26f   : > { %s2345_s21 = smov 256   ;;  %s2346_s24 = smov 16  }
 0x270   : > { %2171 = dma.vmem_to_hbm [thread:$0]  (%p2428_p10), %s3574_s29, 2048, %s3579_s7, %s3583_s8, %s2345_s21, %s2345_s21, %s2346_s24  }
 0x271 PF: > { %p2177_p11 = scmp.ge.s32.totalorder %s2334_s16, 2  ;;  %s1693_s25 = sand.u32 1, %s2322_s3  }
 0x272   : > { %s1694_s28 = scalar_lea.sflag [#allocation8], %s1693_s25 }
 0x273   : > { %p2174_p13 = pnand %p2177_p11, %p2433_p12 }
 0x275   : > { %2317 = dma.done.wait (!%p2174_p13), %s1694_s28, 2048  }
 0x276   : > { %2319 = vsyncadd (!%p2174_p13), %s1694_s28, 4294965248  ;;  %p34_p0 = scmp.ge.s32.totalorder %s2419_s19, 5   ;;  %s3915_s3 = smov %s2326_s14 }
 0x277   : > { %s3916_s14 = smov %s2330_s15  ;;  %s3917_s15 = smov %s2440_s26 }
 0x278   : > { %s3918_s16 = smov %s2419_s19  ;;  %36 = sbr.rel (!%p34_p0) target bundleno = 49 (0x31), region = 74 }
 0x27f   :  { %1699 = vsyncpa [#allocation8], 1 }
 0x280   :  { %1701 = vsyncpa [#allocation8 + $0x1], 1 }

</bundles_post_ra>
